<compile_context>
chip_gen: v5e
topology: v5e:2x2
jax: 0.10.0
libtpu: 0.0.40
codegen_flags: <defaults>
</compile_context>

<pallas_src>
import jax
import jax.numpy as jnp
from jax import lax
from jax.experimental import pallas as pl
from jax.experimental.pallas import tpu as pltpu

EPS = 1e-5


def _round_up(x, m):
    return ((x + m - 1) // m) * m


def _vmem_capacity_bytes():
    try:
        info = pltpu.get_tpu_info()
        cap = getattr(info, "vmem_capacity_bytes", None)
        if cap:
            return int(cap)
    except Exception:
        pass
    return 64 * 1024 * 1024  # conservative (v7x per-TC physical VMEM)


def _make_kernel(batch_true, tile_b, need_mask, cache_h1):
    inv_b = 1.0 / float(batch_true)

    def kernel(x1_ref, x2_ref, x3_ref,
               w1a_ref, w1b_ref, w1c_ref, b1_ref, g1_ref, be1_ref,
               w2_ref, b2_ref, g2_ref, be2_ref,
               w3t_ref, b3_ref,
               o_ref, *scratch):
        if cache_h1:
            h1c_ref, s1h_ref, s2h_ref, s1h2_ref, s2h2_ref = scratch
        else:
            s1h_ref, s2h_ref, s1h2_ref, s2h2_ref = scratch
            h1c_ref = None

        p = pl.program_id(0)   # phase: 0 = BN1 stats, 1 = BN2 stats, 2 = emit
        t = pl.program_id(1)   # batch tile

        # ---- layer 1: fused concat -> Linear(D,H) -> ReLU (bf16 MXU, f32 acc)
        def layer1():
            h = jnp.dot(x1_ref[...], w1a_ref[...], preferred_element_type=jnp.float32)
            h += jnp.dot(x2_ref[...], w1b_ref[...], preferred_element_type=jnp.float32)
            h += jnp.dot(x3_ref[...], w1c_ref[...], preferred_element_type=jnp.float32)
            return jnp.maximum(h + b1_ref[...], 0.0)

        # Fallback path recomputes layer 1 every phase (x is re-fetched then).
        h_all = None if cache_h1 else layer1()

        def load_h1():
            if cache_h1:
                row0 = pl.multiple_of(t * tile_b, tile_b)
                return h1c_ref[pl.ds(row0, tile_b), :]
            return h_all

        def masked(a):
            if not need_mask:
                return a
            row = t * tile_b + lax.broadcasted_iota(jnp.int32, (tile_b, 1), 0)
            return a * (row < batch_true).astype(jnp.float32)

        def bn(a, s1, s2, gamma, beta):
            mu = s1 * inv_b
            var = jnp.maximum(s2 * inv_b - mu * mu, 0.0)   # biased batch variance
            return (a - mu) * lax.rsqrt(var + EPS) * gamma + beta

        def layer2(hn):
            h2 = jnp.dot(hn.astype(w2_ref.dtype), w2_ref[...],
                         preferred_element_type=jnp.float32)
            return jnp.maximum(h2 + b2_ref[...], 0.0)

        @pl.when(jnp.logical_and(p == 0, t == 0))
        def _init():
            s1h_ref[...] = jnp.zeros_like(s1h_ref)
            s2h_ref[...] = jnp.zeros_like(s2h_ref)
            s1h2_ref[...] = jnp.zeros_like(s1h2_ref)
            s2h2_ref[...] = jnp.zeros_like(s2h2_ref)

        @pl.when(p == 0)
        def _accum_bn1_stats():
            h = layer1() if cache_h1 else h_all
            if cache_h1:
                row0 = pl.multiple_of(t * tile_b, tile_b)
                h1c_ref[pl.ds(row0, tile_b), :] = h
            hm = masked(h)
            s1h_ref[...] += jnp.sum(hm, axis=0, keepdims=True)
            s2h_ref[...] += jnp.sum(hm * hm, axis=0, keepdims=True)

        @pl.when(p == 1)
        def _accum_bn2_stats():
            hn = bn(load_h1(), s1h_ref[...], s2h_ref[...], g1_ref[...], be1_ref[...])
            h2m = masked(layer2(hn))
            s1h2_ref[...] += jnp.sum(h2m, axis=0, keepdims=True)
            s2h2_ref[...] += jnp.sum(h2m * h2m, axis=0, keepdims=True)

        @pl.when(p == 2)
        def _emit():
            hn = bn(load_h1(), s1h_ref[...], s2h_ref[...], g1_ref[...], be1_ref[...])
            h2 = layer2(hn)
            h2n = bn(h2, s1h2_ref[...], s2h2_ref[...], g2_ref[...], be2_ref[...])
            # Final Linear(H2,1) as w3_row @ h2n^T -> lane-dense (1, tile_b) row.
            prod = lax.dot_general(
                w3t_ref[...], h2n.astype(w3t_ref.dtype),
                dimension_numbers=(((1,), (1,)), ((), ())),
                preferred_element_type=jnp.float32)        # (8, tile_b); row 0 real
            out_row = prod[0:1, :] + b3_ref[...]
            o_ref[...] = out_row[None].astype(o_ref.dtype)  # (1, 1, tile_b)

    return kernel


def dnn_forward(drug1_feat, drug2_feat, cell_feat, params, *,
                block_b=4096, cache_h1=None, in_dtype=jnp.bfloat16):
    """Forward pass of DNN. Inputs are (B, D1), (B, D2), (B, D3)."""
    B = drug1_feat.shape[0]
    D1, D2, D3 = drug1_feat.shape[1], drug2_feat.shape[1], cell_feat.shape[1]
    D = D1 + D2 + D3
    H = params["w1"].shape[1]
    H2 = params["w2"].shape[1]

    tile_b = _round_up(min(block_b, _round_up(B, 8)), 8)
    Bp = _round_up(B, tile_b)
    nt = Bp // tile_b
    need_mask = (Bp != B)

    itemsize = jnp.dtype(in_dtype).itemsize

    # ---- VMEM budgeting: decide whether the full-batch h1 cache fits -------
    vmem_cap = _vmem_capacity_bytes()
    weight_bytes = (D * H + H * H2 + 8 * H2) * itemsize + (6 * H + 3 * H2 + 2) * 4
    per_step = 2 * tile_b * D * itemsize      # double-buffered input tiles
    per_step += 2 * tile_b * 4                # double-buffered output rows
    per_step += 2 * weight_bytes
    live = 4 * tile_b * (H + H2) * 4          # rough in-kernel f32 temporaries
    stats_bytes = 4 * (H + H2) * 4
    cache_bytes = Bp * H * 4
    if cache_h1 is None:
        cache_h1 = (per_step + live + stats_bytes + cache_bytes + (8 << 20)
                    <= int(0.7 * vmem_cap))
    need = per_step + live + stats_bytes + (cache_bytes if cache_h1 else 0)
    vmem_limit = int(min(int(0.9 * vmem_cap), max(32 << 20, need + (8 << 20))))

    def pad_rows(x):
        x = x.astype(in_dtype)
        return jnp.pad(x, ((0, Bp - B), (0, 0))) if Bp != B else x

    x1, x2, x3 = pad_rows(drug1_feat), pad_rows(drug2_feat), pad_rows(cell_feat)

    # Split W1 so the concat can be fused as three matmuls.
    w1 = params["w1"].astype(in_dtype)
    w1a, w1b, w1c = w1[:D1], w1[D1:D1 + D2], w1[D1 + D2:]
    w2 = params["w2"].astype(in_dtype)
    # w3 transposed and sublane-padded to 8 rows (row 0 is the real one).
    w3t = jnp.zeros((8, H2), jnp.float32).at[0:1, :].set(params["w3"].T)
    w3t = w3t.astype(in_dtype)
    b3 = params["b3"].astype(jnp.float32)                    # (1, 1)

    kernel = _make_kernel(B, tile_b, need_mask, cache_h1)

    if cache_h1:
        # Inputs only advance during phase 0; phases 1/2 keep block 0 resident.
        x_map = lambda p, t: (jnp.where(p == 0, t, 0), 0)
    else:
        x_map = lambda p, t: (t, 0)

    def batch_spec(d):
        return pl.BlockSpec((tile_b, d), x_map)

    def full_spec(a):
        return pl.BlockSpec(a.shape, lambda p, t, n=a.ndim: (0,) * n)

    args = (x1, x2, x3,
            w1a, w1b, w1c,
            params["b1"].astype(jnp.float32), params["g1"].astype(jnp.float32),
            params["be1"].astype(jnp.float32),
            w2, params["b2"].astype(jnp.float32), params["g2"].astype(jnp.float32),
            params["be2"].astype(jnp.float32),
            w3t, b3)

    in_specs = [batch_spec(D1), batch_spec(D2), batch_spec(D3)] + \
               [full_spec(a) for a in args[3:]]

    scratch = []
    if cache_h1:
        scratch.append(pltpu.VMEM((Bp, H), jnp.float32))      # full-batch h1 cache
    scratch += [pltpu.VMEM((1, H), jnp.float32),              # sum(h1)
                pltpu.VMEM((1, H), jnp.float32),              # sum(h1^2)
                pltpu.VMEM((1, H2), jnp.float32),             # sum(h2)
                pltpu.VMEM((1, H2), jnp.float32)]             # sum(h2^2)

    out_pad = pl.pallas_call(
        kernel,
        out_shape=jax.ShapeDtypeStruct((nt, 1, tile_b), jnp.float32),
        grid_spec=pltpu.PrefetchScalarGridSpec(
            num_scalar_prefetch=0,
            grid=(3, nt),                      # (phase, batch tile); tiles innermost
            in_specs=in_specs,
            # Output block only advances in phase 2 -> single writeback per block.
            out_specs=pl.BlockSpec((1, 1, tile_b),
                                   lambda p, t: (jnp.where(p == 2, t, 0), 0, 0)),
            scratch_shapes=scratch),
        compiler_params=pltpu.CompilerParams(
            dimension_semantics=("arbitrary", "arbitrary"),
            vmem_limit_bytes=vmem_limit),
    )(*args)

    return out_pad.reshape(Bp)[:B].reshape(B, 1)


def init_params(key, input_size, hidden_size):
    """Deterministic init mimicking PyTorch Linear defaults (U[-1/sqrt(fan_in), +])."""
    h2 = hidden_size // 2
    ks = jax.random.split(key, 6)

    def lin(kw, kb, fan_in, fan_out):
        bound = 1.0 / jnp.sqrt(jnp.float32(fan_in))
        w = jax.random.uniform(kw, (fan_in, fan_out), jnp.float32, -bound, bound)
        b = jax.random.uniform(kb, (1, fan_out), jnp.float32, -bound, bound)
        return w, b

    w1, b1 = lin(ks[0], ks[1], input_size, hidden_size)
    w2, b2 = lin(ks[2], ks[3], hidden_size, h2)
    w3, b3 = lin(ks[4], ks[5], h2, 1)
    return {
        "w1": w1, "b1": b1,
        "g1": jnp.ones((1, hidden_size), jnp.float32),
        "be1": jnp.zeros((1, hidden_size), jnp.float32),
        "w2": w2, "b2": b2,
        "g2": jnp.ones((1, h2), jnp.float32),
        "be2": jnp.zeros((1, h2), jnp.float32),
        "w3": w3, "b3": b3,
    }


def dnn_reference(feat, p, cast_dtype=None):
    """Pure-JAX reference (training-mode BN).  cast_dtype mirrors the kernel's
    matmul-operand casts so numerics can be compared at tight tolerance."""
    if cast_dtype is None:
        c = lambda a: a
    else:
        c = lambda a: a.astype(cast_dtype).astype(jnp.float32)
    h = jnp.maximum(jnp.dot(c(feat), c(p["w1"])) + p["b1"], 0.0)
    mu, var = jnp.mean(h, 0, keepdims=True), jnp.var(h, 0, keepdims=True)
    h = (h - mu) / jnp.sqrt(var + EPS) * p["g1"] + p["be1"]
    h2 = jnp.maximum(jnp.dot(c(h), c(p["w2"])) + p["b2"], 0.0)
    mu2, var2 = jnp.mean(h2, 0, keepdims=True), jnp.var(h2, 0, keepdims=True)
    h2 = (h2 - mu2) / jnp.sqrt(var2 + EPS) * p["g2"] + p["be2"]
    return jnp.dot(c(h2), c(p["w3"])) + p["b3"]


if __name__ == "__main__":
    key = jax.random.PRNGKey(0)
    k_d1, k_d2, k_c, k_p = jax.random.split(key, 4)

    B = 300                      # not a multiple of the tile -> exercises masking
    D1, D2, DC = 16, 16, 32
    INPUT_SIZE = D1 + D2 + DC    # 64
    HIDDEN = 32

    drug1_feat = jax.random.normal(k_d1, (B, D1), jnp.float32)
    drug2_feat = jax.random.normal(k_d2, (B, D2), jnp.float32)
    cell_feat = jax.random.normal(k_c, (B, DC), jnp.float32)
    params = init_params(k_p, INPUT_SIZE, HIDDEN)

    feat = jnp.concatenate([drug1_feat, drug2_feat, cell_feat], axis=1)
    ref_bf16 = dnn_reference(feat, params, cast_dtype=jnp.bfloat16)
    ref_f32 = dnn_reference(feat, params, cast_dtype=None)

    # block_b=128 -> 3 batch tiles: exercises the pipelined multi-tile path.
    out_cached = dnn_forward(drug1_feat, drug2_feat, cell_feat, params,
                             block_b=128, cache_h1=True)
    out_cached = jax.block_until_ready(out_cached)

    # Also exercise the VMEM-constrained fallback (recompute) path.
    out_nocache = dnn_forward(drug1_feat, drug2_feat, cell_feat, params,
                              block_b=128, cache_h1=False)
    out_nocache = jax.block_until_ready(out_nocache)

    assert out_cached.shape == (B, 1)
    assert out_nocache.shape == (B, 1)
    assert jnp.allclose(out_cached, ref_bf16, atol=1e-2, rtol=1e-2), \
        float(jnp.max(jnp.abs(out_cached - ref_bf16)))
    assert jnp.allclose(out_nocache, ref_bf16, atol=1e-2, rtol=1e-2), \
        float(jnp.max(jnp.abs(out_nocache - ref_bf16)))
    # Sanity vs. the pure-f32 reference (gap is the bf16 input/weight cast).
    assert float(jnp.max(jnp.abs(out_cached - ref_f32))) < 0.25

    print("KERNEL_OK")
</pallas_src>

<mosaic_0001>
module attributes {stable_mosaic.version = 11 : i64} {
  func.func @kernel(%arg0: i32, %arg1: i32, %arg2: memref<128x16xbf16, #tpu.memory_space<vmem>>, %arg3: memref<128x16xbf16, #tpu.memory_space<vmem>>, %arg4: memref<128x32xbf16, #tpu.memory_space<vmem>>, %arg5: memref<16x32xbf16, #tpu.memory_space<vmem>>, %arg6: memref<16x32xbf16, #tpu.memory_space<vmem>>, %arg7: memref<32x32xbf16, #tpu.memory_space<vmem>>, %arg8: memref<1x32xf32, #tpu.memory_space<vmem>>, %arg9: memref<1x32xf32, #tpu.memory_space<vmem>>, %arg10: memref<1x32xf32, #tpu.memory_space<vmem>>, %arg11: memref<32x16xbf16, #tpu.memory_space<vmem>>, %arg12: memref<1x16xf32, #tpu.memory_space<vmem>>, %arg13: memref<1x16xf32, #tpu.memory_space<vmem>>, %arg14: memref<1x16xf32, #tpu.memory_space<vmem>>, %arg15: memref<8x16xbf16, #tpu.memory_space<vmem>>, %arg16: memref<1x1xf32, #tpu.memory_space<vmem>>, %arg17: memref<1x1x128xf32, #tpu.memory_space<vmem>>, %arg18: memref<384x32xf32, #tpu.memory_space<vmem>>, %arg19: memref<1x32xf32, #tpu.memory_space<vmem>>, %arg20: memref<1x32xf32, #tpu.memory_space<vmem>>, %arg21: memref<1x16xf32, #tpu.memory_space<vmem>>, %arg22: memref<1x16xf32, #tpu.memory_space<vmem>>) attributes {dimension_semantics = [#tpu.dimension_semantics<arbitrary>, #tpu.dimension_semantics<arbitrary>], iteration_bounds = array<i64: 3, 3>, scalar_prefetch = 0 : i64, scratch_operands = 5 : i64, tpu.core_type = #tpu.core_type<tc>, window_params = [{transform_indices = @transform_0, window_bounds = array<i64: 128, 16>}, {transform_indices = @transform_1, window_bounds = array<i64: 128, 16>}, {transform_indices = @transform_2, window_bounds = array<i64: 128, 32>}, {pipeline_mode = #tpu.pipeline_mode<synchronous>, transform_indices = @transform_3, window_bounds = array<i64: 16, 32>}, {pipeline_mode = #tpu.pipeline_mode<synchronous>, transform_indices = @transform_4, window_bounds = array<i64: 16, 32>}, {pipeline_mode = #tpu.pipeline_mode<synchronous>, transform_indices = @transform_5, window_bounds = array<i64: 32, 32>}, {pipeline_mode = #tpu.pipeline_mode<synchronous>, transform_indices = @transform_6, window_bounds = array<i64: 1, 32>}, {pipeline_mode = #tpu.pipeline_mode<synchronous>, transform_indices = @transform_7, window_bounds = array<i64: 1, 32>}, {pipeline_mode = #tpu.pipeline_mode<synchronous>, transform_indices = @transform_8, window_bounds = array<i64: 1, 32>}, {pipeline_mode = #tpu.pipeline_mode<synchronous>, transform_indices = @transform_9, window_bounds = array<i64: 32, 16>}, {pipeline_mode = #tpu.pipeline_mode<synchronous>, transform_indices = @transform_10, window_bounds = array<i64: 1, 16>}, {pipeline_mode = #tpu.pipeline_mode<synchronous>, transform_indices = @transform_11, window_bounds = array<i64: 1, 16>}, {pipeline_mode = #tpu.pipeline_mode<synchronous>, transform_indices = @transform_12, window_bounds = array<i64: 1, 16>}, {pipeline_mode = #tpu.pipeline_mode<synchronous>, transform_indices = @transform_13, window_bounds = array<i64: 8, 16>}, {pipeline_mode = #tpu.pipeline_mode<synchronous>, transform_indices = @transform_14, window_bounds = array<i64: 1, 1>}, {transform_indices = @transform_15, window_bounds = array<i64: 1, 1, 128>}]} {
    %c0_i32 = arith.constant 0 : i32
    %0 = arith.cmpi eq, %arg0, %c0_i32 : i32
    %c0_i32_0 = arith.constant 0 : i32
    %1 = arith.cmpi eq, %arg1, %c0_i32_0 : i32
    %2 = arith.andi %0, %1 : i1
    %3 = arith.extui %2 : i1 to i32
    %c0_i32_1 = arith.constant 0 : i32
    %4 = arith.cmpi ne, %3, %c0_i32_1 : i32
    scf.if %4 {
      %cst = arith.constant 0.000000e+00 : f32
      %14 = vector.broadcast %cst : f32 to vector<1x32xf32>
      %c0 = arith.constant 0 : index
      %c0_6 = arith.constant 0 : index
      %15 = vector.load %arg19[%c0, %c0_6] : memref<1x32xf32, #tpu.memory_space<vmem>>, vector<1x32xf32>
      tpu.vector_store %arg19[%c0, %c0_6], %14 {strides = array<i32>} : memref<1x32xf32, #tpu.memory_space<vmem>>, vector<1x32xf32>,
      %cst_7 = arith.constant 0.000000e+00 : f32
      %16 = vector.broadcast %cst_7 : f32 to vector<1x32xf32>
      %c0_8 = arith.constant 0 : index
      %c0_9 = arith.constant 0 : index
      %17 = vector.load %arg20[%c0_8, %c0_9] : memref<1x32xf32, #tpu.memory_space<vmem>>, vector<1x32xf32>
      tpu.vector_store %arg20[%c0_8, %c0_9], %16 {strides = array<i32>} : memref<1x32xf32, #tpu.memory_space<vmem>>, vector<1x32xf32>,
      %cst_10 = arith.constant 0.000000e+00 : f32
      %18 = vector.broadcast %cst_10 : f32 to vector<1x16xf32>
      %c0_11 = arith.constant 0 : index
      %c0_12 = arith.constant 0 : index
      %19 = vector.load %arg21[%c0_11, %c0_12] : memref<1x16xf32, #tpu.memory_space<vmem>>, vector<1x16xf32>
      tpu.vector_store %arg21[%c0_11, %c0_12], %18 {strides = array<i32>} : memref<1x16xf32, #tpu.memory_space<vmem>>, vector<1x16xf32>,
      %cst_13 = arith.constant 0.000000e+00 : f32
      %20 = vector.broadcast %cst_13 : f32 to vector<1x16xf32>
      %c0_14 = arith.constant 0 : index
      %c0_15 = arith.constant 0 : index
      %21 = vector.load %arg22[%c0_14, %c0_15] : memref<1x16xf32, #tpu.memory_space<vmem>>, vector<1x16xf32>
      tpu.vector_store %arg22[%c0_14, %c0_15], %20 {strides = array<i32>} : memref<1x16xf32, #tpu.memory_space<vmem>>, vector<1x16xf32>,
    } else {
    }
    %c0_i32_2 = arith.constant 0 : i32
    %5 = arith.cmpi eq, %arg0, %c0_i32_2 : i32
    %6 = arith.extui %5 : i1 to i32
    %c0_i32_3 = arith.constant 0 : i32
    %7 = arith.cmpi ne, %6, %c0_i32_3 : i32
    scf.if %7 {
      %c0 = arith.constant 0 : index
      %c0_6 = arith.constant 0 : index
      %14 = vector.load %arg2[%c0, %c0_6] : memref<128x16xbf16, #tpu.memory_space<vmem>>, vector<128x16xbf16>
      %c0_7 = arith.constant 0 : index
      %c0_8 = arith.constant 0 : index
      %15 = vector.load %arg5[%c0_7, %c0_8] : memref<16x32xbf16, #tpu.memory_space<vmem>>, vector<16x32xbf16>
      %cst = arith.constant dense<0.000000e+00> : vector<128x32xf32>
      %16 = tpu.matmul %14, %15, %cst {dimension_numbers = #tpu.dot_dimension_numbers<[1], [0], [0], [1], [0, 0, 1, 1], [], []>} : vector<128x16xbf16>, vector<16x32xbf16>, vector<128x32xf32> -> vector<128x32xf32>
      %c0_9 = arith.constant 0 : index
      %c0_10 = arith.constant 0 : index
      %17 = vector.load %arg3[%c0_9, %c0_10] : memref<128x16xbf16, #tpu.memory_space<vmem>>, vector<128x16xbf16>
      %c0_11 = arith.constant 0 : index
      %c0_12 = arith.constant 0 : index
      %18 = vector.load %arg6[%c0_11, %c0_12] : memref<16x32xbf16, #tpu.memory_space<vmem>>, vector<16x32xbf16>
      %cst_13 = arith.constant dense<0.000000e+00> : vector<128x32xf32>
      %19 = tpu.matmul %17, %18, %cst_13 {dimension_numbers = #tpu.dot_dimension_numbers<[1], [0], [0], [1], [0, 0, 1, 1], [], []>} : vector<128x16xbf16>, vector<16x32xbf16>, vector<128x32xf32> -> vector<128x32xf32>
      %20 = arith.addf %16, %19 : vector<128x32xf32>
      %c0_14 = arith.constant 0 : index
      %c0_15 = arith.constant 0 : index
      %21 = vector.load %arg4[%c0_14, %c0_15] : memref<128x32xbf16, #tpu.memory_space<vmem>>, vector<128x32xbf16>
      %c0_16 = arith.constant 0 : index
      %c0_17 = arith.constant 0 : index
      %22 = vector.load %arg7[%c0_16, %c0_17] : memref<32x32xbf16, #tpu.memory_space<vmem>>, vector<32x32xbf16>
      %cst_18 = arith.constant dense<0.000000e+00> : vector<128x32xf32>
      %23 = tpu.matmul %21, %22, %cst_18 {dimension_numbers = #tpu.dot_dimension_numbers<[1], [0], [0], [1], [0, 0, 1, 1], [], []>} : vector<128x32xbf16>, vector<32x32xbf16>, vector<128x32xf32> -> vector<128x32xf32>
      %24 = arith.addf %20, %23 : vector<128x32xf32>
      %c0_19 = arith.constant 0 : index
      %c0_20 = arith.constant 0 : index
      %25 = vector.load %arg8[%c0_19, %c0_20] : memref<1x32xf32, #tpu.memory_space<vmem>>, vector<1x32xf32>
      %26 = vector.broadcast %25 : vector<1x32xf32> to vector<128x32xf32>
      %27 = arith.addf %24, %26 : vector<128x32xf32>
      %cst_21 = arith.constant 0.000000e+00 : f32
      %28 = vector.broadcast %cst_21 : f32 to vector<128x32xf32>
      %29 = arith.maximumf %27, %28 : vector<128x32xf32>
      %c128_i32 = arith.constant 128 : i32
      %30 = arith.muli %arg1, %c128_i32 : i32
      %31 = tpu.assume_multiple %30, 128 : i32
      %32 = arith.index_cast %31 : i32 to index
      %c0_22 = arith.constant 0 : index
      %33 = vector.load %arg18[%32, %c0_22] : memref<384x32xf32, #tpu.memory_space<vmem>>, vector<128x32xf32>
      tpu.vector_store %arg18[%32, %c0_22], %29 {strides = array<i32>} : memref<384x32xf32, #tpu.memory_space<vmem>>, vector<128x32xf32>,
      %c128_i32_23 = arith.constant 128 : i32
      %34 = arith.muli %arg1, %c128_i32_23 : i32
      %35 = tpu.iota {dimensions = array<i32: 0>} : vector<128x1xi32>
      %36 = vector.broadcast %34 : i32 to vector<128x1xi32>
      %37 = arith.addi %36, %35 : vector<128x1xi32>
      %c300_i32 = arith.constant 300 : i32
      %38 = vector.broadcast %c300_i32 : i32 to vector<128x1xi32>
      %39 = arith.cmpi slt, %37, %38 : vector<128x1xi32>
      %40 = arith.extui %39 : vector<128x1xi1> to vector<128x1xi32>
      %41 = arith.sitofp %40 : vector<128x1xi32> to vector<128x1xf32>
      %42 = vector.broadcast %41 : vector<128x1xf32> to vector<128x32xf32>
      %43 = arith.mulf %29, %42 : vector<128x32xf32>
      %c0_24 = arith.constant 0 : index
      %c0_25 = arith.constant 0 : index
      %44 = vector.load %arg19[%c0_24, %c0_25] : memref<1x32xf32, #tpu.memory_space<vmem>>, vector<1x32xf32>
      %cst_26 = arith.constant dense<0.000000e+00> : vector<32xf32>
      %45 = vector.multi_reduction <add>, %43, %cst_26 [0] : vector<128x32xf32> to vector<32xf32>
      %46 = vector.shape_cast %45 : vector<32xf32> to vector<1x32xf32>
      %47 = arith.addf %44, %46 : vector<1x32xf32>
      %c0_27 = arith.constant 0 : index
      %c0_28 = arith.constant 0 : index
      %48 = vector.load %arg19[%c0_27, %c0_28] : memref<1x32xf32, #tpu.memory_space<vmem>>, vector<1x32xf32>
      tpu.vector_store %arg19[%c0_27, %c0_28], %47 {strides = array<i32>} : memref<1x32xf32, #tpu.memory_space<vmem>>, vector<1x32xf32>,
      %c0_29 = arith.constant 0 : index
      %c0_30 = arith.constant 0 : index
      %49 = vector.load %arg20[%c0_29, %c0_30] : memref<1x32xf32, #tpu.memory_space<vmem>>, vector<1x32xf32>
      %50 = arith.mulf %43, %43 : vector<128x32xf32>
      %cst_31 = arith.constant dense<0.000000e+00> : vector<32xf32>
      %51 = vector.multi_reduction <add>, %50, %cst_31 [0] : vector<128x32xf32> to vector<32xf32>
      %52 = vector.shape_cast %51 : vector<32xf32> to vector<1x32xf32>
      %53 = arith.addf %49, %52 : vector<1x32xf32>
      %c0_32 = arith.constant 0 : index
      %c0_33 = arith.constant 0 : index
      %54 = vector.load %arg20[%c0_32, %c0_33] : memref<1x32xf32, #tpu.memory_space<vmem>>, vector<1x32xf32>
      tpu.vector_store %arg20[%c0_32, %c0_33], %53 {strides = array<i32>} : memref<1x32xf32, #tpu.memory_space<vmem>>, vector<1x32xf32>,
    } else {
    }
    %c1_i32 = arith.constant 1 : i32
    %8 = arith.cmpi eq, %arg0, %c1_i32 : i32
    %9 = arith.extui %8 : i1 to i32
    %c0_i32_4 = arith.constant 0 : i32
    %10 = arith.cmpi ne, %9, %c0_i32_4 : i32
    scf.if %10 {
      %c128_i32 = arith.constant 128 : i32
      %14 = arith.muli %arg1, %c128_i32 : i32
      %15 = tpu.assume_multiple %14, 128 : i32
      %16 = arith.index_cast %15 : i32 to index
      %c0 = arith.constant 0 : index
      %17 = vector.load %arg18[%16, %c0] : memref<384x32xf32, #tpu.memory_space<vmem>>, vector<128x32xf32>
      %c0_6 = arith.constant 0 : index
      %c0_7 = arith.constant 0 : index
      %18 = vector.load %arg19[%c0_6, %c0_7] : memref<1x32xf32, #tpu.memory_space<vmem>>, vector<1x32xf32>
      %c0_8 = arith.constant 0 : index
      %c0_9 = arith.constant 0 : index
      %19 = vector.load %arg20[%c0_8, %c0_9] : memref<1x32xf32, #tpu.memory_space<vmem>>, vector<1x32xf32>
      %c0_10 = arith.constant 0 : index
      %c0_11 = arith.constant 0 : index
      %20 = vector.load %arg9[%c0_10, %c0_11] : memref<1x32xf32, #tpu.memory_space<vmem>>, vector<1x32xf32>
      %c0_12 = arith.constant 0 : index
      %c0_13 = arith.constant 0 : index
      %21 = vector.load %arg10[%c0_12, %c0_13] : memref<1x32xf32, #tpu.memory_space<vmem>>, vector<1x32xf32>
      %cst = arith.constant 0.00333333341 : f32
      %22 = vector.broadcast %cst : f32 to vector<1x32xf32>
      %23 = arith.mulf %18, %22 : vector<1x32xf32>
      %cst_14 = arith.constant 0.00333333341 : f32
      %24 = vector.broadcast %cst_14 : f32 to vector<1x32xf32>
      %25 = arith.mulf %19, %24 : vector<1x32xf32>
      %26 = arith.mulf %23, %23 : vector<1x32xf32>
      %27 = arith.subf %25, %26 : vector<1x32xf32>
      %cst_15 = arith.constant 0.000000e+00 : f32
      %28 = vector.broadcast %cst_15 : f32 to vector<1x32xf32>
      %29 = arith.maximumf %27, %28 : vector<1x32xf32>
      %30 = vector.broadcast %23 : vector<1x32xf32> to vector<128x32xf32>
      %31 = arith.subf %17, %30 : vector<128x32xf32>
      %cst_16 = arith.constant 9.99999974E-6 : f32
      %32 = vector.broadcast %cst_16 : f32 to vector<1x32xf32>
      %33 = arith.addf %29, %32 : vector<1x32xf32>
      %34 = math.rsqrt %33 : vector<1x32xf32>
      %35 = vector.broadcast %34 : vector<1x32xf32> to vector<128x32xf32>
      %36 = arith.mulf %31, %35 : vector<128x32xf32>
      %37 = vector.broadcast %20 : vector<1x32xf32> to vector<128x32xf32>
      %38 = arith.mulf %36, %37 : vector<128x32xf32>
      %39 = vector.broadcast %21 : vector<1x32xf32> to vector<128x32xf32>
      %40 = arith.addf %38, %39 : vector<128x32xf32>
      %41 = arith.truncf %40 : vector<128x32xf32> to vector<128x32xbf16>
      %c0_17 = arith.constant 0 : index
      %c0_18 = arith.constant 0 : index
      %42 = vector.load %arg11[%c0_17, %c0_18] : memref<32x16xbf16, #tpu.memory_space<vmem>>, vector<32x16xbf16>
      %cst_19 = arith.constant dense<0.000000e+00> : vector<128x16xf32>
      %43 = tpu.matmul %41, %42, %cst_19 {dimension_numbers = #tpu.dot_dimension_numbers<[1], [0], [0], [1], [0, 0, 1, 1], [], []>} : vector<128x32xbf16>, vector<32x16xbf16>, vector<128x16xf32> -> vector<128x16xf32>
      %c0_20 = arith.constant 0 : index
      %c0_21 = arith.constant 0 : index
      %44 = vector.load %arg12[%c0_20, %c0_21] : memref<1x16xf32, #tpu.memory_space<vmem>>, vector<1x16xf32>
      %45 = vector.broadcast %44 : vector<1x16xf32> to vector<128x16xf32>
      %46 = arith.addf %43, %45 : vector<128x16xf32>
      %cst_22 = arith.constant 0.000000e+00 : f32
      %47 = vector.broadcast %cst_22 : f32 to vector<128x16xf32>
      %48 = arith.maximumf %46, %47 : vector<128x16xf32>
      %c128_i32_23 = arith.constant 128 : i32
      %49 = arith.muli %arg1, %c128_i32_23 : i32
      %50 = tpu.iota {dimensions = array<i32: 0>} : vector<128x1xi32>
      %51 = vector.broadcast %49 : i32 to vector<128x1xi32>
      %52 = arith.addi %51, %50 : vector<128x1xi32>
      %c300_i32 = arith.constant 300 : i32
      %53 = vector.broadcast %c300_i32 : i32 to vector<128x1xi32>
      %54 = arith.cmpi slt, %52, %53 : vector<128x1xi32>
      %55 = arith.extui %54 : vector<128x1xi1> to vector<128x1xi32>
      %56 = arith.sitofp %55 : vector<128x1xi32> to vector<128x1xf32>
      %57 = vector.broadcast %56 : vector<128x1xf32> to vector<128x16xf32>
      %58 = arith.mulf %48, %57 : vector<128x16xf32>
      %c0_24 = arith.constant 0 : index
      %c0_25 = arith.constant 0 : index
      %59 = vector.load %arg21[%c0_24, %c0_25] : memref<1x16xf32, #tpu.memory_space<vmem>>, vector<1x16xf32>
      %cst_26 = arith.constant dense<0.000000e+00> : vector<16xf32>
      %60 = vector.multi_reduction <add>, %58, %cst_26 [0] : vector<128x16xf32> to vector<16xf32>
      %61 = vector.shape_cast %60 : vector<16xf32> to vector<1x16xf32>
      %62 = arith.addf %59, %61 : vector<1x16xf32>
      %c0_27 = arith.constant 0 : index
      %c0_28 = arith.constant 0 : index
      %63 = vector.load %arg21[%c0_27, %c0_28] : memref<1x16xf32, #tpu.memory_space<vmem>>, vector<1x16xf32>
      tpu.vector_store %arg21[%c0_27, %c0_28], %62 {strides = array<i32>} : memref<1x16xf32, #tpu.memory_space<vmem>>, vector<1x16xf32>,
      %c0_29 = arith.constant 0 : index
      %c0_30 = arith.constant 0 : index
      %64 = vector.load %arg22[%c0_29, %c0_30] : memref<1x16xf32, #tpu.memory_space<vmem>>, vector<1x16xf32>
      %65 = arith.mulf %58, %58 : vector<128x16xf32>
      %cst_31 = arith.constant dense<0.000000e+00> : vector<16xf32>
      %66 = vector.multi_reduction <add>, %65, %cst_31 [0] : vector<128x16xf32> to vector<16xf32>
      %67 = vector.shape_cast %66 : vector<16xf32> to vector<1x16xf32>
      %68 = arith.addf %64, %67 : vector<1x16xf32>
      %c0_32 = arith.constant 0 : index
      %c0_33 = arith.constant 0 : index
      %69 = vector.load %arg22[%c0_32, %c0_33] : memref<1x16xf32, #tpu.memory_space<vmem>>, vector<1x16xf32>
      tpu.vector_store %arg22[%c0_32, %c0_33], %68 {strides = array<i32>} : memref<1x16xf32, #tpu.memory_space<vmem>>, vector<1x16xf32>,
    } else {
    }
    %c2_i32 = arith.constant 2 : i32
    %11 = arith.cmpi eq, %arg0, %c2_i32 : i32
    %12 = arith.extui %11 : i1 to i32
    %c0_i32_5 = arith.constant 0 : i32
    %13 = arith.cmpi ne, %12, %c0_i32_5 : i32
    scf.if %13 {
      %c128_i32 = arith.constant 128 : i32
      %14 = arith.muli %arg1, %c128_i32 : i32
      %15 = tpu.assume_multiple %14, 128 : i32
      %16 = arith.index_cast %15 : i32 to index
      %c0 = arith.constant 0 : index
      %17 = vector.load %arg18[%16, %c0] : memref<384x32xf32, #tpu.memory_space<vmem>>, vector<128x32xf32>
      %c0_6 = arith.constant 0 : index
      %c0_7 = arith.constant 0 : index
      %18 = vector.load %arg19[%c0_6, %c0_7] : memref<1x32xf32, #tpu.memory_space<vmem>>, vector<1x32xf32>
      %c0_8 = arith.constant 0 : index
      %c0_9 = arith.constant 0 : index
      %19 = vector.load %arg20[%c0_8, %c0_9] : memref<1x32xf32, #tpu.memory_space<vmem>>, vector<1x32xf32>
      %c0_10 = arith.constant 0 : index
      %c0_11 = arith.constant 0 : index
      %20 = vector.load %arg9[%c0_10, %c0_11] : memref<1x32xf32, #tpu.memory_space<vmem>>, vector<1x32xf32>
      %c0_12 = arith.constant 0 : index
      %c0_13 = arith.constant 0 : index
      %21 = vector.load %arg10[%c0_12, %c0_13] : memref<1x32xf32, #tpu.memory_space<vmem>>, vector<1x32xf32>
      %cst = arith.constant 0.00333333341 : f32
      %22 = vector.broadcast %cst : f32 to vector<1x32xf32>
      %23 = arith.mulf %18, %22 : vector<1x32xf32>
      %cst_14 = arith.constant 0.00333333341 : f32
      %24 = vector.broadcast %cst_14 : f32 to vector<1x32xf32>
      %25 = arith.mulf %19, %24 : vector<1x32xf32>
      %26 = arith.mulf %23, %23 : vector<1x32xf32>
      %27 = arith.subf %25, %26 : vector<1x32xf32>
      %cst_15 = arith.constant 0.000000e+00 : f32
      %28 = vector.broadcast %cst_15 : f32 to vector<1x32xf32>
      %29 = arith.maximumf %27, %28 : vector<1x32xf32>
      %30 = vector.broadcast %23 : vector<1x32xf32> to vector<128x32xf32>
      %31 = arith.subf %17, %30 : vector<128x32xf32>
      %cst_16 = arith.constant 9.99999974E-6 : f32
      %32 = vector.broadcast %cst_16 : f32 to vector<1x32xf32>
      %33 = arith.addf %29, %32 : vector<1x32xf32>
      %34 = math.rsqrt %33 : vector<1x32xf32>
      %35 = vector.broadcast %34 : vector<1x32xf32> to vector<128x32xf32>
      %36 = arith.mulf %31, %35 : vector<128x32xf32>
      %37 = vector.broadcast %20 : vector<1x32xf32> to vector<128x32xf32>
      %38 = arith.mulf %36, %37 : vector<128x32xf32>
      %39 = vector.broadcast %21 : vector<1x32xf32> to vector<128x32xf32>
      %40 = arith.addf %38, %39 : vector<128x32xf32>
      %41 = arith.truncf %40 : vector<128x32xf32> to vector<128x32xbf16>
      %c0_17 = arith.constant 0 : index
      %c0_18 = arith.constant 0 : index
      %42 = vector.load %arg11[%c0_17, %c0_18] : memref<32x16xbf16, #tpu.memory_space<vmem>>, vector<32x16xbf16>
      %cst_19 = arith.constant dense<0.000000e+00> : vector<128x16xf32>
      %43 = tpu.matmul %41, %42, %cst_19 {dimension_numbers = #tpu.dot_dimension_numbers<[1], [0], [0], [1], [0, 0, 1, 1], [], []>} : vector<128x32xbf16>, vector<32x16xbf16>, vector<128x16xf32> -> vector<128x16xf32>
      %c0_20 = arith.constant 0 : index
      %c0_21 = arith.constant 0 : index
      %44 = vector.load %arg12[%c0_20, %c0_21] : memref<1x16xf32, #tpu.memory_space<vmem>>, vector<1x16xf32>
      %45 = vector.broadcast %44 : vector<1x16xf32> to vector<128x16xf32>
      %46 = arith.addf %43, %45 : vector<128x16xf32>
      %cst_22 = arith.constant 0.000000e+00 : f32
      %47 = vector.broadcast %cst_22 : f32 to vector<128x16xf32>
      %48 = arith.maximumf %46, %47 : vector<128x16xf32>
      %c0_23 = arith.constant 0 : index
      %c0_24 = arith.constant 0 : index
      %49 = vector.load %arg21[%c0_23, %c0_24] : memref<1x16xf32, #tpu.memory_space<vmem>>, vector<1x16xf32>
      %c0_25 = arith.constant 0 : index
      %c0_26 = arith.constant 0 : index
      %50 = vector.load %arg22[%c0_25, %c0_26] : memref<1x16xf32, #tpu.memory_space<vmem>>, vector<1x16xf32>
      %c0_27 = arith.constant 0 : index
      %c0_28 = arith.constant 0 : index
      %51 = vector.load %arg13[%c0_27, %c0_28] : memref<1x16xf32, #tpu.memory_space<vmem>>, vector<1x16xf32>
      %c0_29 = arith.constant 0 : index
      %c0_30 = arith.constant 0 : index
      %52 = vector.load %arg14[%c0_29, %c0_30] : memref<1x16xf32, #tpu.memory_space<vmem>>, vector<1x16xf32>
      %cst_31 = arith.constant 0.00333333341 : f32
      %53 = vector.broadcast %cst_31 : f32 to vector<1x16xf32>
      %54 = arith.mulf %49, %53 : vector<1x16xf32>
      %cst_32 = arith.constant 0.00333333341 : f32
      %55 = vector.broadcast %cst_32 : f32 to vector<1x16xf32>
      %56 = arith.mulf %50, %55 : vector<1x16xf32>
      %57 = arith.mulf %54, %54 : vector<1x16xf32>
      %58 = arith.subf %56, %57 : vector<1x16xf32>
      %cst_33 = arith.constant 0.000000e+00 : f32
      %59 = vector.broadcast %cst_33 : f32 to vector<1x16xf32>
      %60 = arith.maximumf %58, %59 : vector<1x16xf32>
      %61 = vector.broadcast %54 : vector<1x16xf32> to vector<128x16xf32>
      %62 = arith.subf %48, %61 : vector<128x16xf32>
      %cst_34 = arith.constant 9.99999974E-6 : f32
      %63 = vector.broadcast %cst_34 : f32 to vector<1x16xf32>
      %64 = arith.addf %60, %63 : vector<1x16xf32>
      %65 = math.rsqrt %64 : vector<1x16xf32>
      %66 = vector.broadcast %65 : vector<1x16xf32> to vector<128x16xf32>
      %67 = arith.mulf %62, %66 : vector<128x16xf32>
      %68 = vector.broadcast %51 : vector<1x16xf32> to vector<128x16xf32>
      %69 = arith.mulf %67, %68 : vector<128x16xf32>
      %70 = vector.broadcast %52 : vector<1x16xf32> to vector<128x16xf32>
      %71 = arith.addf %69, %70 : vector<128x16xf32>
      %c0_35 = arith.constant 0 : index
      %c0_36 = arith.constant 0 : index
      %72 = vector.load %arg15[%c0_35, %c0_36] : memref<8x16xbf16, #tpu.memory_space<vmem>>, vector<8x16xbf16>
      %73 = arith.truncf %71 : vector<128x16xf32> to vector<128x16xbf16>
      %cst_37 = arith.constant dense<0.000000e+00> : vector<8x128xf32>
      %74 = tpu.matmul %72, %73, %cst_37 {dimension_numbers = #tpu.dot_dimension_numbers<[1], [1], [0], [0], [0, 0, 1, 0], [], []>} : vector<8x16xbf16>, vector<128x16xbf16>, vector<8x128xf32> -> vector<8x128xf32>
      %75 = vector.extract_strided_slice %74 {offsets = [0, 0], sizes = [1, 128], strides = [1, 1]} : vector<8x128xf32> to vector<1x128xf32>
      %c0_38 = arith.constant 0 : index
      %c0_39 = arith.constant 0 : index
      %76 = vector.load %arg16[%c0_38, %c0_39] : memref<1x1xf32, #tpu.memory_space<vmem>>, vector<1x1xf32>
      %77 = vector.broadcast %76 : vector<1x1xf32> to vector<1x128xf32>
      %78 = arith.addf %75, %77 : vector<1x128xf32>
      %79 = vector.shape_cast %78 : vector<1x128xf32> to vector<1x1x128xf32>
      %c0_40 = arith.constant 0 : index
      %c0_41 = arith.constant 0 : index
      %c0_42 = arith.constant 0 : index
      %80 = vector.load %arg17[%c0_40, %c0_41, %c0_42] : memref<1x1x128xf32, #tpu.memory_space<vmem>>, vector<1x1x128xf32>
      tpu.vector_store %arg17[%c0_40, %c0_41, %c0_42], %79 {strides = array<i32>} : memref<1x1x128xf32, #tpu.memory_space<vmem>>, vector<1x1x128xf32>,
    } else {
    }
    return
  }
  func.func @transform_0(%arg0: i32, %arg1: i32) -> (i32, i32) {
    %c0_i32 = arith.constant 0 : i32
    %0 = arith.cmpi eq, %arg0, %c0_i32 : i32
    %c0_i32_0 = arith.constant 0 : i32
    %1 = arith.select %0, %arg1, %c0_i32_0 : i32
    %c0_i32_1 = arith.constant 0 : i32
    %c0_i32_2 = arith.constant 0 : i32
    return %1, %c0_i32_1 : i32, i32
  }
  func.func @transform_1(%arg0: i32, %arg1: i32) -> (i32, i32) {
    %c0_i32 = arith.constant 0 : i32
    %0 = arith.cmpi eq, %arg0, %c0_i32 : i32
    %c0_i32_0 = arith.constant 0 : i32
    %1 = arith.select %0, %arg1, %c0_i32_0 : i32
    %c0_i32_1 = arith.constant 0 : i32
    %c0_i32_2 = arith.constant 0 : i32
    return %1, %c0_i32_1 : i32, i32
  }
  func.func @transform_2(%arg0: i32, %arg1: i32) -> (i32, i32) {
    %c0_i32 = arith.constant 0 : i32
    %0 = arith.cmpi eq, %arg0, %c0_i32 : i32
    %c0_i32_0 = arith.constant 0 : i32
    %1 = arith.select %0, %arg1, %c0_i32_0 : i32
    %c0_i32_1 = arith.constant 0 : i32
    %c0_i32_2 = arith.constant 0 : i32
    return %1, %c0_i32_1 : i32, i32
  }
  func.func @transform_3(%arg0: i32, %arg1: i32) -> (i32, i32) {
    %c0_i32 = arith.constant 0 : i32
    %c0_i32_0 = arith.constant 0 : i32
    %c0_i32_1 = arith.constant 0 : i32
    return %c0_i32, %c0_i32_0 : i32, i32
  }
  func.func @transform_4(%arg0: i32, %arg1: i32) -> (i32, i32) {
    %c0_i32 = arith.constant 0 : i32
    %c0_i32_0 = arith.constant 0 : i32
    %c0_i32_1 = arith.constant 0 : i32
    return %c0_i32, %c0_i32_0 : i32, i32
  }
  func.func @transform_5(%arg0: i32, %arg1: i32) -> (i32, i32) {
    %c0_i32 = arith.constant 0 : i32
    %c0_i32_0 = arith.constant 0 : i32
    %c0_i32_1 = arith.constant 0 : i32
    return %c0_i32, %c0_i32_0 : i32, i32
  }
  func.func @transform_6(%arg0: i32, %arg1: i32) -> (i32, i32) {
    %c0_i32 = arith.constant 0 : i32
    %c0_i32_0 = arith.constant 0 : i32
    %c0_i32_1 = arith.constant 0 : i32
    return %c0_i32, %c0_i32_0 : i32, i32
  }
  func.func @transform_7(%arg0: i32, %arg1: i32) -> (i32, i32) {
    %c0_i32 = arith.constant 0 : i32
    %c0_i32_0 = arith.constant 0 : i32
    %c0_i32_1 = arith.constant 0 : i32
    return %c0_i32, %c0_i32_0 : i32, i32
  }
  func.func @transform_8(%arg0: i32, %arg1: i32) -> (i32, i32) {
    %c0_i32 = arith.constant 0 : i32
    %c0_i32_0 = arith.constant 0 : i32
    %c0_i32_1 = arith.constant 0 : i32
    return %c0_i32, %c0_i32_0 : i32, i32
  }
  func.func @transform_9(%arg0: i32, %arg1: i32) -> (i32, i32) {
    %c0_i32 = arith.constant 0 : i32
    %c0_i32_0 = arith.constant 0 : i32
    %c0_i32_1 = arith.constant 0 : i32
    return %c0_i32, %c0_i32_0 : i32, i32
  }
  func.func @transform_10(%arg0: i32, %arg1: i32) -> (i32, i32) {
    %c0_i32 = arith.constant 0 : i32
    %c0_i32_0 = arith.constant 0 : i32
    %c0_i32_1 = arith.constant 0 : i32
    return %c0_i32, %c0_i32_0 : i32, i32
  }
  func.func @transform_11(%arg0: i32, %arg1: i32) -> (i32, i32) {
    %c0_i32 = arith.constant 0 : i32
    %c0_i32_0 = arith.constant 0 : i32
    %c0_i32_1 = arith.constant 0 : i32
    return %c0_i32, %c0_i32_0 : i32, i32
  }
  func.func @transform_12(%arg0: i32, %arg1: i32) -> (i32, i32) {
    %c0_i32 = arith.constant 0 : i32
    %c0_i32_0 = arith.constant 0 : i32
    %c0_i32_1 = arith.constant 0 : i32
    return %c0_i32, %c0_i32_0 : i32, i32
  }
  func.func @transform_13(%arg0: i32, %arg1: i32) -> (i32, i32) {
    %c0_i32 = arith.constant 0 : i32
    %c0_i32_0 = arith.constant 0 : i32
    %c0_i32_1 = arith.constant 0 : i32
    return %c0_i32, %c0_i32_0 : i32, i32
  }
  func.func @transform_14(%arg0: i32, %arg1: i32) -> (i32, i32) {
    %c0_i32 = arith.constant 0 : i32
    %c0_i32_0 = arith.constant 0 : i32
    %c0_i32_1 = arith.constant 0 : i32
    return %c0_i32, %c0_i32_0 : i32, i32
  }
  func.func @transform_15(%arg0: i32, %arg1: i32) -> (i32, i32, i32) {
    %c2_i32 = arith.constant 2 : i32
    %0 = arith.cmpi eq, %arg0, %c2_i32 : i32
    %c0_i32 = arith.constant 0 : i32
    %1 = arith.select %0, %arg1, %c0_i32 : i32
    %c0_i32_0 = arith.constant 0 : i32
    %c0_i32_1 = arith.constant 0 : i32
    %c0_i32_2 = arith.constant 0 : i32
    return %1, %c0_i32_0, %c0_i32_1 : i32, i32, i32
  }
}

</mosaic_0001>

<bundles_post_ra>
// kernel: tpu_custom_call.1
= control target key start
LH: loop header
LB: loop body
LE: loop exit
PB: predicated region body
PF: predicated region fallthrough
CT: control target
= control target key end

     0   :  { %s3663_s0 = inlined_call_operand.vmem [shape: bf16[384,16], index: 0, kind: input, shape index: {}]   ;;  %s3664_s1 = inlined_call_operand.vmem [shape: bf16[384,16], index: 1, kind: input, shape index: {}]   ;;  %s3665_s2 = inlined_call_operand.vmem [shape: bf16[384,32], index: 2, kind: input, shape index: {}]   ;;  %s3666_s3 = inlined_call_operand.vmem [shape: bf16[16,32], index: 3, kind: input, shape index: {}]   ;;  %s3667_s4 = inlined_call_operand.vmem [shape: bf16[16,32], index: 4, kind: input, shape index: {}]   ;;  %s3668_s5 = inlined_call_operand.vmem [shape: bf16[32,32], index: 5, kind: input, shape index: {}]   ;;  %s3669_s6 = inlined_call_operand.vmem [shape: f32[1,32], index: 6, kind: input, shape index: {}]   ;;  %s3670_s7 = inlined_call_operand.vmem [shape: f32[1,32], index: 7, kind: input, shape index: {}]   ;;  %s3671_s8 = inlined_call_operand.vmem [shape: f32[1,32], index: 8, kind: input, shape index: {}]   ;;  %s3672_s9 = inlined_call_operand.vmem [shape: bf16[32,16], index: 9, kind: input, shape index: {}]   ;;  %s3673_s10 = inlined_call_operand.vmem [shape: f32[1,16], index: 10, kind: input, shape index: {}]   ;;  %s3674_s11 = inlined_call_operand.vmem [shape: f32[1,16], index: 11, kind: input, shape index: {}]   ;;  %s3675_s12 = inlined_call_operand.vmem [shape: f32[1,16], index: 12, kind: input, shape index: {}]   ;;  %s3676_s13 = inlined_call_operand.vmem [shape: bf16[8,16], index: 13, kind: input, shape index: {}]   ;;  %s3677_s14 = inlined_call_operand.<no memory space> [shape: f32[1,1], index: 14, kind: input, shape index: {}]   ;;  %s3678_s15 = inlined_call_operand.hbm [shape: f32[3,1,128], index: 15, kind: output, shape index: {}]  }
   0x1   :  { %3689 = sst [smem:[#allocation20_spill]] %s3663_s0  ;;  %v20_v0 = vstv %s3677_s14 }
   0x2   :  { %3690 = sst [smem:[#allocation21_spill]] %s3664_s1  ;;  %21 = vst [vmem:[#allocation7] sm:$0x1] %v20_v0 }
   0x3   :  { %3691 = sst [smem:[#allocation22_spill]] %s3678_s15 }
   0x4   :  { %22 = vsyncpa [#allocation9], 0 }
   0x5   :  { %24 = vsyncpa [#allocation9 + $0x1], 0  ;;  %s2776_s20 = smov 0   ;;  %s2778_s21 = smov 0  }
   0x6   :  { %s2780_s22 = smov 0   ;;  %s2782_s23 = smov 0  }
   0x7   :  { %s2784_s24 = smov 0   ;;  %s2786_s25 = smov 0  }
   0x8   :  { %s2788_s26 = smov 0   ;;  %s2790_s27 = smov 0  }
   0x9 LB: > { %3692 = sst [smem:[#allocation11_spill]] %s2659_s20  ;;  %s2236_s14 = sadd.s32 4294967295, %s2687_s27   ;;  %s2687_s27 = sphi %s2790_s27, %s30_s27   ;;  %s2683_s26 = sphi %s2788_s26, %s3719_s26   ;;  %s2679_s25 = sphi %s2786_s25, %s3718_s25   ;;  %s2675_s24 = sphi %s2784_s24, %s3717_s24   ;;  %s2671_s23 = sphi %s2782_s23, %s3716_s23   ;;  %s2667_s22 = sphi %s2780_s22, %s3715_s22   ;;  %s2663_s21 = sphi %s2778_s21, %s3721_s21   ;;  %s2659_s20 = sphi %s2776_s20, %s3720_s20  }
   0xa   : > { %3693 = sst [smem:[#allocation12_spill]] %s2667_s22  ;;  %s39_s28 = sadd.s32 1, %s2679_s25 }
   0xb   : > { %3694 = sst [smem:[#allocation13_spill]] %s2679_s25  ;;  %s42_s29 = sadd.s32 1, %s2683_s26 }
   0xc   : > { %3695 = sst [smem:[#allocation14_spill]] %s2683_s26  ;;  %p40_p0 = scmp.ge.s32.totalorder %s39_s28, 3 }
   0xd   : > { %3696 = sst [smem:[#allocation15_spill]] %s2687_s27  ;;  %p388_p1 = scmp.eq.s32.totalorder %s2683_s26, 2 }
   0xe   : > { %s2237_s30 = sadd.s32 4294967294, %s2687_s27   ;;  %p405_p2 = scmp.ne.s32.totalorder %s2667_s22, %s2663_s21 }
   0xf   : > { %s3723_s28 = smov (%p40_p0, %s39_s28), 0  ;;  %s3725_s29 = smov (!%p40_p0, %s42_s29), %s2683_s26 }
  0x10   : > { %3697 = sst [smem:[#allocation16_spill]] %s3723_s28  ;;  %p44_p3 = scmp.ge.s32.totalorder %s3725_s29, 3 }
  0x11   : > { %s389_s16 = scalar_select %p388_p1, %s2679_s25, 0 }
  0x12   : > { %p406_p4 = scmp.eq.s32.totalorder %s2236_s14, 8  ;;  %p411_p5 = scmp.ne.s32.totalorder %s2663_s21, %s2659_s20 }
  0x13   : > { %p412_p6 = scmp.eq.s32.totalorder %s2237_s30, 8  ;;  %s3727_s29 = smov (%p44_p3, %s3725_s29), 0 }
  0x14   : > { %3698 = sst [smem:[#allocation17_spill]] %s3727_s29  ;;  %p2831_p7 = por %p406_p4, %p405_p2 }
  0x15   : > { %p2835_p8 = por %p412_p6, %p411_p5  ;;  %p390_p9 = scmp.eq.s32.totalorder %s3727_s29, 2 }
  0x16   : > { %p2240_p10 = scmp.ge.s32.totalorder %s2687_s27, 1  ;;  %p505_p11 = scmp.lt.s32.totalorder %s2687_s27, 10 }
  0x17   : > { %s3700_s18 = scalar_select %p2835_p8, 1, 0 }
  0x18   : > { %s391_s19 = scalar_select %p390_p9, %s3723_s28, 0 }
  0x19   : > { %3701 = sst [smem:[#allocation18_spill]] %s3700_s18  ;;  %p506_p12 = pnand %p2240_p10, %p505_p11 }
  0x1a   : > { %s392_s26 = ssub.s32 %s389_s16, %s391_s19  ;;  %s395_s14 = sadd.s32 1, %s2667_s22 }
  0x1b   : > { %p393_p13 = scmp.eq.s32.totalorder %s392_s26, 0  ;;  %509 = sbr.rel (%p506_p12) target bundleno = 1035 (0x40b), region = 80 }
  0x1c   : > { %p568_p0 = scmp.eq.s32.totalorder (!%p506_p12), %s2675_s24, 0  ;;  %p602_p1 = scmp.eq.s32.totalorder (!%p506_p12), %s2671_s23, 0 }
  0x1d   : > { %s2845_s30 = scalar_select %p393_p13, %s2667_s22, %s395_s14  }
  0x1e   : > { %p603_p2 = pnand (!%p506_p12), %p602_p1, %p568_p0  ;;  %s3703_s0 = sld [smem:[#allocation20_spill]] (!%p506_p12) }
  0x1f   : > { %3702 = sst [smem:[#allocation19_spill]] %s2845_s30  ;;  %s3705_s15 = sand.u32 (!%p506_p12), 1, %s2663_s21  }
  0x20   : > { %s569_s18 = scalar_select %p568_p0, %s2671_s23, 0 }
  0x21   : > { %s3704_s1 = sld [smem:[#allocation21_spill]] }
  0x22   : > { %s2241_s29 = sshll.u32 %s569_s18, 4  ;;  %s2868_s18 = scalar_lea.vmem [#allocation8], %s3705_s15 }
  0x23   : > { %p571_p3 = scmp.lt.s32.totalorder %s2241_s29, 47 }
  0x24   : > { %606 = sbr.rel (%p603_p2) target bundleno = 46 (0x2e), region = 84 }
  0x25   : > { %s3729_s29 = smov (!%p571_p3, %s2241_s29), 47 }
  0x26   : > { %s2242_s28 = sshll.u32 %s3729_s29, 2 }
  0x27   : > { %s2854_s26 = scalar_lea.vmem %s3703_s0, %s2242_s28  ;;  %s2859_s22 = scalar_lea.vmem %s3704_s1, %s2242_s28 }
  0x28   : > { %s2864_s27 = scalar_lea.vmem %s3665_s2, %s2242_s28 }
  0x29   : > { %vm607_vm0 = vcmask 253952   ;;  %vm610_vm1 = vcmask 122880   ;;  %v2689_v1 = vmov 0.0  }
  0x2a   : > { %608 = vst.msk [vmem:[#allocation3] sm:$0x1] %vm607_vm0, %v2689_v1 }
  0x2b   : > { %609 = vst.msk [vmem:[#allocation4] sm:$0x1] %vm607_vm0, %v2689_v1 }
  0x2c   : > { %611 = vst.msk [vmem:[#allocation5] sm:$0x1] %vm610_vm1, %v2689_v1 }
  0x2d   : > { %612 = vst.msk [vmem:[#allocation6] sm:$0x1] %vm610_vm1, %v2689_v1 }
  0x2e PF: > { %p2247_p4 = scmp.ne.s32.totalorder %s2675_s24, 0 }
  0x2f   : > { %s2384_s14 = sshll.u32 (!%p2247_p4), %s2671_s23, 7 }
  0x30   : > { %615 = sbr.rel (%p2247_p4) target bundleno = 322 (0x142), region = 88 }
  0x35   : > { %v2473_v2 = vld [vmem:[%s3667_s4] sm:$0xff]  ;;  %v2483_v4 = vld [vmem:[%s3668_s5 + $0x8] sm:$0xff]  ;;  %v2472_v6 = vld [vmem:[%s2859_s22 + $0x38] sm:$0xff]  ;;  %vm698_vm2 = vcmask 130048   ;;  %vm963_vm3 = vcmask 261120   ;;  %v1107_v32 = vlaneseq  ;;  %v2936_v37 = vstv %s2384_s14 }
  0x36   : > { %v2464_v3 = vld [vmem:[%s3666_s3] sm:$0xff]  ;;  %730 = vmatpush.bf16.msra.mxu0 %v2473_v2  ;;  %2488 = vmatpush.bf16.msra.mxu3 %v2473_v2  ;;  %v2466_v10 = vld [vmem:[%s2859_s22 + $0x8] sm:$0xff]  ;;  %v2463_v11 = vld [vmem:[%s2854_s26 + $0x38] sm:$0xff]  ;;  %v2690_v51 = vmov 0.0  }
  0x37   : > { %v2465_v5 = vld [vmem:[%s2859_s22] sm:$0xff]  ;;  %849 = vmatpush.bf16.msra.mxu1 %v2464_v3  ;;  %994 = vmatpush.bf16.msra.mxu2 %v2483_v4  ;;  %v2457_v12 = vld [vmem:[%s2854_s26 + $0x8] sm:$0xff]  ;;  %v2467_v14 = vld [vmem:[%s2859_s22 + $0x10] sm:$0xff]  ;;  %v2934_v35 = vshrl.u32 %v1107_v32, 7 }
  0x38   : > { %v2456_v7 = vld [vmem:[%s2854_s26] sm:$0xff]  ;;  %v2475_v13 = vld [vmem:[%s2864_s27 + $0x8] sm:$0xff]  ;;  %v2480_v15 = vld [vmem:[%s2864_s27 + $0x30] sm:$0xff] }
  0x39   : > { %v2482_v8 = vld [vmem:[%s3668_s5] sm:$0xff]  ;;  %2284 = vmatmul.msk.bf16.vlgmr.msra.gmra.mxu0 %vm698_vm2, %v2465_v5  ;;  %2291 = vmatmul.msk.bf16.vlgmr.msra.gmra.mxu3 %vm698_vm2, %v2472_v6  ;;  %v2458_v16 = vld [vmem:[%s2854_s26 + $0x10] sm:$0xff]  ;;  %v2468_v18 = vld [vmem:[%s2859_s22 + $0x18] sm:$0xff]  ;;  %v1125_v42 = vadd.s32 %v2936_v37, %v2934_v35  ;;  %v1109_v43 = vadd.s32 8, %v2934_v35 }
  0x3a   : > { %2489 = vmatpush.bf16.msrb.mxu3 %v2464_v3  ;;  %2328 = vmatmul.msk.bf16.vlgmr.msra.gmra.mxu1 %vm698_vm2, %v2456_v7  ;;  %v2474_v9 = vld [vmem:[%s2864_s27] sm:$0xff]  ;;  %v2476_v17 = vld [vmem:[%s2864_s27 + $0x10] sm:$0xff]  ;;  %v2481_v19 = vld [vmem:[%s2864_s27 + $0x38] sm:$0xff] }
  0x3b   : > { %995 = vmatpush.bf16.msra.mxu2 %v2482_v8  ;;  %v2459_v20 = vld [vmem:[%s2854_s26 + $0x18] sm:$0xff]  ;;  %v2469_v22 = vld [vmem:[%s2859_s22 + $0x20] sm:$0xff]  ;;  %v2470_v25 = vld [vmem:[%s2859_s22 + $0x28] sm:$0xff]  ;;  %vm1141_vm4 = vcmp.lt.s32.totalorder %v1125_v42, 300  ;;  %v1126_v48 = vadd.s32 %v2936_v37, %v1109_v43 }
  0x3c   : > { %v2477_v21 = vld [vmem:[%s2864_s27 + $0x18] sm:$0xff]  ;;  %v2460_v23 = vld [vmem:[%s2854_s26 + $0x20] sm:$0xff]  ;;  %v2461_v26 = vld [vmem:[%s2854_s26 + $0x28] sm:$0xff]  ;;  %v2385_v52 = vsel %vm1141_vm4, 1.0, %v2690_v51 }
  0x3d   : > { %v2478_v24 = vld [vmem:[%s2864_s27 + $0x20] sm:$0xff]  ;;  %v2479_v27 = vld [vmem:[%s2864_s27 + $0x28] sm:$0xff]  ;;  %v2471_v28 = vld [vmem:[%s2859_s22 + $0x30] sm:$0xff]  ;;  %vm1142_vm5 = vcmp.lt.s32.totalorder %v1126_v48, 300 }
  0x3e   : > { %2490 = vmatpush.bf16.msra.mxu3 %v2483_v4  ;;  %2376 = vmatmul.msk.bf16.vlgmr.msra.gmra.mxu2 %vm963_vm3, %v2474_v9  ;;  %v2462_v29 = vld [vmem:[%s2854_s26 + $0x30] sm:$0xff]  ;;  %v2941_v39 = vld [vmem:[%s3669_s6] ss:$0 sm:$0xff]  ;;  %s2950_s26 = scalar_lea.vmem [#allocation2], %s2384_s14  ;;  %v2386_v58 = vsel %vm1142_vm5, 1.0, %v2690_v51  ;;  %vm1244_vm5 = vcmask 253952  }
  0x42   : > { %2491 = vmatpush.bf16.msra.mxu3 %v2482_v8 }
  0x49   : > { %2285 = vmatmul.msk.bf16.gmra.mxu0 %vm698_vm2, %v2466_v10  ;;  %2335 = vmatmul.msk.bf16.vlgmr.msrb.gmra.mxu3 %vm698_vm2, %v2463_v11 }
  0x4a   : > { %2329 = vmatmul.msk.bf16.gmra.mxu1 %vm698_vm2, %v2457_v12 }
  0x4e   : > { %2377 = vmatmul.msk.bf16.gmra.mxu2 %vm963_vm3, %v2475_v13 }
  0x59   : > { %2286 = vmatmul.msk.bf16.gmra.mxu0 %vm698_vm2, %v2467_v14  ;;  %2382 = vmatmul.msk.bf16.vlgmr.msra.gmra.mxu3 %vm963_vm3, %v2480_v15 }
  0x5a   : > { %2330 = vmatmul.msk.bf16.gmra.mxu1 %vm698_vm2, %v2458_v16 }
  0x5e   : > { %2378 = vmatmul.msk.bf16.gmra.mxu2 %vm963_vm3, %v2476_v17 }
  0x69   : > { %2287 = vmatmul.msk.bf16.gmra.mxu0 %vm698_vm2, %v2468_v18  ;;  %2383 = vmatmul.msk.bf16.gmra.mxu3 %vm963_vm3, %v2481_v19 }
  0x6a   : > { %2331 = vmatmul.msk.bf16.gmra.mxu1 %vm698_vm2, %v2459_v20 }
  0x6e   : > { %2379 = vmatmul.msk.bf16.gmra.mxu2 %vm963_vm3, %v2477_v21 }
  0x79   : > { %2288 = vmatmul.msk.bf16.gmra.mxu0 %vm698_vm2, %v2469_v22 }
  0x7a   : > { %2332 = vmatmul.msk.bf16.gmra.mxu1 %vm698_vm2, %v2460_v23 }
  0x7e   : > { %2380 = vmatmul.msk.bf16.gmra.mxu2 %vm963_vm3, %v2478_v24 }
  0x89   : > { %2289 = vmatmul.msk.bf16.gmra.mxu0 %vm698_vm2, %v2470_v25 }
  0x8a   : > { %2333 = vmatmul.msk.bf16.gmra.mxu1 %vm698_vm2, %v2461_v26 }
  0x8e   : > { %2381 = vmatmul.msk.bf16.gmra.mxu2 %vm963_vm3, %v2479_v27 }
  0x99   : > { %2290 = vmatmul.msk.bf16.gmra.mxu0 %vm698_vm2, %v2471_v28 }
  0x9a   : > { %2334 = vmatmul.msk.bf16.gmra.mxu1 %vm698_vm2, %v2462_v29 }
  0xb6   : > { %v732_v30 = vpop.f32.mrf.mxu0 }
  0xb7   : > { %v851_v31 = vpop.f32.mrf.mxu1 }
  0xb8   : > { %v852_v38 = vadd.f32 %v851_v31, %v732_v30 }
  0xbc   : > { %v2931_v33 = vpop.f32.mrf.mxu3 }
  0xbe   : > { %v734_v34 = vpop.f32.mrf.mxu0 }
  0xbf   : > { %v853_v36 = vpop.f32.mrf.mxu1 }
  0xc0   : > { %v854_v50 = vadd.f32 %v853_v36, %v734_v34 }
  0xc1   : > { %v997_v40 = vpop.f32.mrf.mxu2 }
  0xc2   : > { %v1037_v41 = vadd.f32 %v997_v40, %v852_v38 }
  0xc4   : > { %v1057_v44 = vadd.f32 %v2941_v39, %v1037_v41  ;;  %v2947_v45 = vpop.f32.mrf.mxu3 }
  0xc6   : > { %v1073_v46 = vmax.f32 %v1057_v44, 0.0  ;;  %v737_v47 = vpop.f32.mrf.mxu0 }
  0xc7   : > { %v856_v49 = vpop.f32.mrf.mxu1 }
  0xc8   : > { %1091 = vst.msk [vmem:[%s2950_s26] sm:$0xff] %vm963_vm3, %v1073_v46  ;;  %v1189_v55 = vmul.f32 %v2385_v52, %v1073_v46  ;;  %v857_v63 = vadd.f32 %v856_v49, %v737_v47 }
  0xc9   : > { %v999_v53 = vpop.f32.mrf.mxu2 }
  0xca   : > { %v1038_v54 = vadd.f32 %v999_v53, %v854_v50  ;;  %v1247_v62 = vmul.f32 %v1189_v55, %v1189_v55  ;;  %v1206_v2 = vsel %vm963_vm3, %v1189_v55, 0.0 }
  0xcc   : > { %v1058_v56 = vadd.f32 %v2941_v39, %v1038_v54  ;;  %v886_v57 = vpop.f32.mrf.mxu3  ;;  %v1263_v7 = vsel %vm963_vm3, %v1247_v62, 0.0  ;;  %v1111_v62 = vadd.s32 24, %v2934_v35 }
  0xcd   : > { %v887_v32 = vadd.f32 %v886_v57, %v2931_v33 }
  0xce   : > { %v1074_v59 = vmax.f32 %v1058_v56, 0.0  ;;  %v739_v60 = vpop.f32.mrf.mxu0 }
  0xcf   : > { %v858_v61 = vpop.f32.mrf.mxu1 }
  0xd0   : > { %1092 = vst.msk [vmem:[%s2950_s26 + $0x8] sm:$0xff] %vm963_vm3, %v1074_v59  ;;  %v1190_v0 = vmul.f32 %v2386_v58, %v1074_v59  ;;  %v859_v15 = vadd.f32 %v858_v61, %v739_v60  ;;  %v1110_v59 = vadd.s32 16, %v2934_v35 }
  0xd1   : > { %v1002_v1 = vpop.f32.mrf.mxu2 }
  0xd2   : > { %v1207_v3 = vsel %vm963_vm3, %v1190_v0, 0.0  ;;  %v1248_v4 = vmul.f32 %v1190_v0, %v1190_v0  ;;  %v1039_v5 = vadd.f32 %v1002_v1, %v857_v63  ;;  %v1127_v0 = vadd.s32 %v2936_v37, %v1110_v59 }
  0xd3   : > { %v2961_v6 = vadd.f32 %v1207_v3, %v1206_v2  ;;  %v1112_v2 = vadd.s32 32, %v2934_v35  ;;  %v1128_v3 = vadd.s32 %v2936_v37, %v1111_v62 }
  0xd4   : > { %v1264_v8 = vsel %vm963_vm3, %v1248_v4, 0.0  ;;  %v2966_v9 = vadd.f32 %v2941_v39, %v1039_v5  ;;  %v888_v10 = vpop.f32.mrf.mxu3  ;;  %vm1143_vm6 = vcmp.lt.s32.totalorder %v1127_v0, 300 }
  0xd5   : > { %v2968_v11 = vadd.f32 %v1264_v8, %v1263_v7  ;;  %v889_v50 = vadd.f32 %v888_v10, %v2947_v45  ;;  %v1113_v8 = vadd.s32 40, %v2934_v35  ;;  %vm1144_vm7 = vcmp.lt.s32.totalorder %v1128_v3, 300 }
  0xd6   : > { %v1075_v12 = vmax.f32 %v2966_v9, 0.0  ;;  %v742_v13 = vpop.f32.mrf.mxu0 }
  0xd7   : > { %v861_v14 = vpop.f32.mrf.mxu1 }
  0xd8   : > { %1093 = vst.msk [vmem:[%s2950_s26 + $0x10] sm:$0xff] %vm963_vm3, %v1075_v12  ;;  %v862_v23 = vadd.f32 %v861_v14, %v742_v13  ;;  %v1129_v13 = vadd.s32 %v2936_v37, %v1112_v2 }
  0xd9   : > { %v1004_v16 = vpop.f32.mrf.mxu2 }
  0xda   : > { %v1040_v17 = vadd.f32 %v1004_v16, %v859_v15  ;;  %v1114_v15 = vadd.s32 48, %v2934_v35  ;;  %vm1145_vm8 = vcmp.lt.s32.totalorder %v1129_v13, 300 }
  0xdc   : > { %v2976_v18 = vadd.f32 %v2941_v39, %v1040_v17  ;;  %v2978_v19 = vpop.f32.mrf.mxu3  ;;  %v2387_v17 = vsel %vm1143_vm6, 1.0, %v2690_v51 }
  0xde   : > { %v1076_v20 = vmax.f32 %v2976_v18, 0.0  ;;  %v744_v21 = vpop.f32.mrf.mxu0 }
  0xdf   : > { %v863_v22 = vpop.f32.mrf.mxu1 }
  0xe0   : > { %1094 = vst.msk [vmem:[%s2950_s26 + $0x18] sm:$0xff] %vm963_vm3, %v1076_v20  ;;  %v864_v31 = vadd.f32 %v863_v22, %v744_v21  ;;  %v1130_v21 = vadd.s32 %v2936_v37, %v1113_v8 }
  0xe1   : > { %v1007_v24 = vpop.f32.mrf.mxu2 }
  0xe2   : > { %v1041_v25 = vadd.f32 %v1007_v24, %v862_v23  ;;  %v2388_v23 = vsel %vm1144_vm7, 1.0, %v2690_v51  ;;  %v1191_v24 = vmul.f32 %v2387_v17, %v1075_v12  ;;  %vm1146_vm9 = vcmp.lt.s32.totalorder %v1130_v21, 300 }
  0xe3   : > { %v1192_v9 = vmul.f32 %v2388_v23, %v1076_v20  ;;  %v1122_v12 = vadd.s32 112, %v2934_v35  ;;  %v1119_v21 = vadd.s32 88, %v2934_v35 }
  0xe4   : > { %v2986_v26 = vadd.f32 %v2941_v39, %v1041_v25  ;;  %v2988_v27 = vpop.f32.mrf.mxu3  ;;  %v1131_v25 = vadd.s32 %v2936_v37, %v1114_v15  ;;  %v1209_v18 = vsel %vm963_vm3, %v1191_v24, 0.0 }
  0xe5   : > { %v3076_v59 = vadd.s32 %v2936_v37, %v1122_v12 }
  0xe6   : > { %v1077_v28 = vmax.f32 %v2986_v26, 0.0  ;;  %v747_v29 = vpop.f32.mrf.mxu0  ;;  %vm1147_vm10 = vcmp.lt.s32.totalorder %v1131_v25, 300 }
  0xe7   : > { %v866_v30 = vpop.f32.mrf.mxu1  ;;  %v2391_v26 = vsel %vm1147_vm10, 1.0, %v2690_v51  ;;  %vm1155_vm1 = vcmp.lt.s32.totalorder %v3076_v59, 300 }
  0xe8   : > { %1095 = vst.msk [vmem:[%s2950_s26 + $0x20] sm:$0xff] %vm963_vm3, %v1077_v28  ;;  %v867_v47 = vadd.f32 %v866_v30, %v747_v29  ;;  %v1115_v29 = vadd.s32 56, %v2934_v35  ;;  %v2399_v59 = vsel %vm1155_vm1, 1.0, %v2690_v51 }
  0xe9   : > { %v1009_v34 = vpop.f32.mrf.mxu2 }
  0xea   : > { %v1042_v36 = vadd.f32 %v1009_v34, %v864_v31  ;;  %v2389_v34 = vsel %vm1145_vm8, 1.0, %v2690_v51 }
  0xec   : > { %v2997_v38 = vadd.f32 %v2941_v39, %v1042_v36  ;;  %v1032_v40 = vpop.f32.mrf.mxu3 }
  0xed   : > { %v1051_v41 = vadd.f32 %v1032_v40, %v887_v32  ;;  %v1116_v40 = vadd.s32 64, %v2934_v35 }
  0xee   : > { %v1078_v42 = vmax.f32 %v2997_v38, 0.0  ;;  %v749_v43 = vpop.f32.mrf.mxu0 }
  0xef   : > { %v3001_v44 = vadd.f32 %v2941_v39, %v1051_v41  ;;  %v868_v46 = vpop.f32.mrf.mxu1  ;;  %v1133_v20 = vadd.s32 %v2936_v37, %v1116_v40 }
  0xf0   : > { %1096 = vst.msk [vmem:[%s2950_s26 + $0x28] sm:$0xff] %vm963_vm3, %v1078_v42  ;;  %v869_v45 = vadd.f32 %v868_v46, %v749_v43  ;;  %v1249_v43 = vmul.f32 %v1191_v24, %v1191_v24  ;;  %v1132_v46 = vadd.s32 %v2936_v37, %v1115_v29 }
  0xf1   : > { %v1087_v33 = vmax.f32 %v3001_v44, 0.0  ;;  %v1012_v48 = vpop.f32.mrf.mxu2  ;;  %vm1149_vm12 = vcmp.lt.s32.totalorder %v1133_v20, 300 }
  0xf2   : > { %v1043_v49 = vadd.f32 %v1012_v48, %v867_v47  ;;  %v1193_v48 = vmul.f32 %v2389_v34, %v1077_v28  ;;  %v1266_v28 = vsel %vm963_vm3, %v1249_v43, 0.0  ;;  %vm1148_vm11 = vcmp.lt.s32.totalorder %v1132_v46, 300 }
  0xf3   : > { %1105 = vst.msk [vmem:[%s2950_s26 + $0x70] sm:$0xff] %vm963_vm3, %v1087_v33  ;;  %v2392_v13 = vsel %vm1148_vm11, 1.0, %v2690_v51 }
  0xf4   : > { %v3014_v52 = vadd.f32 %v2941_v39, %v1043_v49  ;;  %v1034_v53 = vpop.f32.mrf.mxu3  ;;  %v2390_v49 = vsel %vm1146_vm9, 1.0, %v2690_v51  ;;  %v1251_v0 = vmul.f32 %v1193_v48, %v1193_v48  ;;  %v1213_v15 = vsel %vm963_vm3, %v1193_v48, 0.0 }
  0xf5   : > { %v1052_v54 = vadd.f32 %v1034_v53, %v889_v50  ;;  %v1123_v50 = vadd.s32 120, %v2934_v35  ;;  %v1117_v53 = vadd.s32 72, %v2934_v35 }
  0xf6   : > { %v1079_v55 = vmax.f32 %v3014_v52, 0.0  ;;  %v752_v56 = vpop.f32.mrf.mxu0  ;;  %v1270_v24 = vsel %vm963_vm3, %v1251_v0, 0.0 }
  0xf7   : > { %v3018_v57 = vadd.f32 %v2941_v39, %v1052_v54  ;;  %v871_v58 = vpop.f32.mrf.mxu1  ;;  %v3084_v2 = vadd.s32 %v2936_v37, %v1123_v50  ;;  %v1134_v3 = vadd.s32 %v2936_v37, %v1117_v53 }
  0xf8   : > { %1097 = vst.msk [vmem:[%s2950_s26 + $0x30] sm:$0xff] %vm963_vm3, %v1079_v55  ;;  %v872_v10 = vadd.f32 %v871_v58, %v752_v56  ;;  %v1118_v56 = vadd.s32 80, %v2934_v35  ;;  %v1250_v58 = vmul.f32 %v1192_v9, %v1192_v9 }
  0xf9   : > { %v1088_v60 = vmax.f32 %v3018_v57, 0.0  ;;  %v1014_v61 = vpop.f32.mrf.mxu2  ;;  %vm1150_vm13 = vcmp.lt.s32.totalorder %v1134_v3, 300  ;;  %vm1156_vm2 = vcmp.lt.s32.totalorder %v3084_v2, 300 }
  0xfa   : > { %v1044_v63 = vadd.f32 %v1014_v61, %v869_v45  ;;  %v1194_v45 = vmul.f32 %v2390_v49, %v1078_v42  ;;  %v1135_v38 = vadd.s32 %v2936_v37, %v1118_v56  ;;  %v1267_v42 = vadd.f32 %v1266_v28, %v2968_v11 }
  0xfb   : > { %1106 = vst.msk [vmem:[%s2950_s26 + $0x78] sm:$0xff] %vm963_vm3, %v1088_v60  ;;  %v2393_v11 = vsel %vm1149_vm12, 1.0, %v2690_v51  ;;  %v2394_v40 = vsel %vm1150_vm13, 1.0, %v2690_v51 }
  0xfc   : > { %v3033_v1 = vadd.f32 %v2941_v39, %v1044_v63  ;;  %v1210_v63 = vadd.f32 %v1209_v18, %v2961_v6  ;;  %v1195_v6 = vmul.f32 %v2391_v26, %v1079_v55  ;;  %v1215_v25 = vsel %vm963_vm3, %v1194_v45, 0.0 }
  0xfd   : > { %vm1151_vm14 = vcmp.lt.s32.totalorder %v1135_v38, 300  ;;  %v1120_v55 = vadd.s32 96, %v2934_v35  ;;  %v1121_v26 = vadd.s32 104, %v2934_v35 }
  0xfe   : > { %v1080_v4 = vmax.f32 %v3033_v1, 0.0  ;;  %v754_v5 = vpop.f32.mrf.mxu0  ;;  %v2395_v48 = vsel %vm1151_vm14, 1.0, %v2690_v51  ;;  %v1217_v50 = vsel %vm963_vm3, %v1195_v6, 0.0 }
  0xff   : > { %v873_v7 = vpop.f32.mrf.mxu1  ;;  %v1137_v53 = vadd.s32 %v2936_v37, %v1120_v55 }
 0x100   : > { %1098 = vst.msk [vmem:[%s2950_s26 + $0x38] sm:$0xff] %vm963_vm3, %v1080_v4  ;;  %v874_v36 = vadd.f32 %v873_v7, %v754_v5  ;;  %v1211_v7 = vsel %vm963_vm3, %v1192_v9, 0.0  ;;  %v1196_v34 = vmul.f32 %v2392_v13, %v1080_v4 }
 0x101   : > { %v1017_v14 = vpop.f32.mrf.mxu2  ;;  %v1212_v23 = vadd.f32 %v1211_v7, %v1210_v63  ;;  %vm1153_vm0 = vcmp.lt.s32.totalorder %v1137_v53, 300 }
 0x102   : > { %v1045_v16 = vadd.f32 %v1017_v14, %v872_v10  ;;  %v1268_v10 = vsel %vm963_vm3, %v1250_v58, 0.0 }
 0x103   : > { %v1269_v29 = vadd.f32 %v1268_v10, %v1267_v42 }
 0x104   : > { %v3048_v22 = vadd.f32 %v2941_v39, %v1045_v16  ;;  %v1252_v16 = vmul.f32 %v1194_v45, %v1194_v45  ;;  %v1219_v45 = vsel %vm963_vm3, %v1196_v34, 0.0 }
 0x105   : > { %v1271_v43 = vadd.f32 %v1270_v24, %v1269_v29 }
 0x106   : > { %v1081_v30 = vmax.f32 %v3048_v22, 0.0  ;;  %v757_v31 = vpop.f32.mrf.mxu0 }
 0x107   : > { %v876_v32 = vpop.f32.mrf.mxu1 }
 0x108   : > { %1099 = vst.msk [vmem:[%s2950_s26 + $0x40] sm:$0xff] %vm963_vm3, %v1081_v30  ;;  %v877_v8 = vadd.f32 %v876_v32, %v757_v31  ;;  %v1214_v31 = vadd.f32 %v1213_v15, %v1212_v23  ;;  %v1253_v32 = vmul.f32 %v1195_v6, %v1195_v6  ;;  %v1138_v6 = vadd.s32 %v2936_v37, %v1121_v26 }
 0x109   : > { %v1019_v41 = vpop.f32.mrf.mxu2 }
 0x10a   : > { %v1046_v47 = vadd.f32 %v1019_v41, %v874_v36  ;;  %v1272_v36 = vsel %vm963_vm3, %v1252_v16, 0.0  ;;  %v1136_v41 = vadd.s32 %v2936_v37, %v1119_v21  ;;  %v1216_v46 = vadd.f32 %v1215_v25, %v1214_v31 }
 0x10b   : > { %v1273_v18 = vadd.f32 %v1272_v36, %v1271_v43  ;;  %v1274_v20 = vsel %vm963_vm3, %v1253_v32, 0.0  ;;  %v2397_v16 = vsel %vm1153_vm0, 1.0, %v2690_v51  ;;  %vm1154_vm4 = vcmp.lt.s32.totalorder %v1138_v6, 300 }
 0x10c   : > { %v1066_v54 = vadd.f32 %v2941_v39, %v1046_v47  ;;  %v1197_v47 = vmul.f32 %v2393_v11, %v1081_v30  ;;  %vm1152_vm15 = vcmp.lt.s32.totalorder %v1136_v41, 300  ;;  %v1218_v28 = vadd.f32 %v1217_v50, %v1216_v46 }
 0x10d   : > { %v1275_v0 = vadd.f32 %v1274_v20, %v1273_v18  ;;  %v2400_v43 = vsel %vm1156_vm2, 1.0, %v2690_v51 }
 0x10e   : > { %v1082_v61 = vmax.f32 %v1066_v54, 0.0  ;;  %v759_v62 = vpop.f32.mrf.mxu0  ;;  %v1254_v54 = vmul.f32 %v1196_v34, %v1196_v34  ;;  %v1220_v35 = vadd.f32 %v1219_v45, %v1218_v28 }
 0x10f   : > { %v878_v5 = vpop.f32.mrf.mxu1 }
 0x110   : > { %1100 = vst.msk [vmem:[%s2950_s26 + $0x48] sm:$0xff] %vm963_vm3, %v1082_v61  ;;  %v879_v1 = vadd.f32 %v878_v5, %v759_v62  ;;  %v1198_v56 = vmul.f32 %v2394_v40, %v1082_v61  ;;  %v1255_v62 = vmul.f32 %v1197_v47, %v1197_v47  ;;  %v1276_v61 = vsel %vm963_vm3, %v1254_v54, 0.0 }
 0x111   : > { %v1022_v14 = vpop.f32.mrf.mxu2  ;;  %v1277_v21 = vadd.f32 %v1276_v61, %v1275_v0 }
 0x112   : > { %v1047_v17 = vadd.f32 %v1022_v14, %v877_v8  ;;  %v1256_v7 = vmul.f32 %v1198_v56, %v1198_v56  ;;  %v2396_v8 = vsel %vm1152_vm15, 1.0, %v2690_v51  ;;  %v1278_v13 = vsel %vm963_vm3, %v1255_v62, 0.0 }
 0x113   : > { %v1223_v14 = vsel %vm963_vm3, %v1198_v56, 0.0 }
 0x114   : > { %v1067_v52 = vadd.f32 %v2941_v39, %v1047_v17  ;;  %v1280_v37 = vsel %vm963_vm3, %v1256_v7, 0.0 }
 0x116   : > { %v1083_v9 = vmax.f32 %v1067_v52, 0.0  ;;  %v762_v12 = vpop.f32.mrf.mxu0  ;;  %v1279_v52 = vadd.f32 %v1278_v13, %v1277_v21  ;;  %v1246_v13 = vld [vmem:[#allocation4] sm:$0x1] }
 0x117   : > { %v881_v49 = vpop.f32.mrf.mxu1 }
 0x118   : > { %1101 = vst.msk [vmem:[%s2950_s26 + $0x50] sm:$0xff] %vm963_vm3, %v1083_v9  ;;  %v882_v4 = vadd.f32 %v881_v49, %v762_v12  ;;  %v1199_v63 = vmul.f32 %v2395_v48, %v1083_v9  ;;  %v1281_v40 = vadd.f32 %v1280_v37, %v1279_v52  ;;  %v2398_v48 = vsel %vm1154_vm4, 1.0, %v2690_v51 }
 0x119   : > { %v1024_v58 = vpop.f32.mrf.mxu2 }
 0x11a   : > { %v1049_v22 = vadd.f32 %v2978_v19, %v882_v4  ;;  %v1048_v30 = vadd.f32 %v1024_v58, %v879_v1  ;;  %v1221_v19 = vsel %vm963_vm3, %v1197_v47, 0.0  ;;  %v1257_v15 = vmul.f32 %v1199_v63, %v1199_v63 }
 0x11b   : > { %v1222_v23 = vadd.f32 %v1221_v19, %v1220_v35  ;;  %v1225_v25 = vsel %vm963_vm3, %v1199_v63, 0.0  ;;  %v1204_v4 = vmul.f32 %v2400_v43, %v1088_v60 }
 0x11c   : > { %v1069_v3 = vadd.f32 %v2941_v39, %v1049_v22  ;;  %v1068_v5 = vadd.f32 %v2941_v39, %v1048_v30  ;;  %v1282_v31 = vsel %vm963_vm3, %v1257_v15, 0.0 }
 0x11d   : > { %v1224_v55 = vadd.f32 %v1223_v14, %v1222_v23  ;;  %v1283_v46 = vadd.f32 %v1282_v31, %v1281_v40  ;;  %v1262_v58 = vmul.f32 %v1204_v4, %v1204_v4  ;;  %v1235_v26 = vsel %vm963_vm3, %v1204_v4, 0.0 }
 0x11e   : > { %v1085_v38 = vmax.f32 %v1069_v3, 0.0  ;;  %v1084_v42 = vmax.f32 %v1068_v5, 0.0  ;;  %v764_v10 = vpop.f32.mrf.mxu0 }
 0x11f   : > { %v883_v17 = vpop.f32.mrf.mxu1  ;;  %v1226_v9 = vadd.f32 %v1225_v25, %v1224_v55  ;;  %v1292_v62 = vsel %vm963_vm3, %v1262_v58, 0.0 }
 0x120   : > { %1103 = vst.msk [vmem:[%s2950_s26 + $0x60] sm:$0xff] %vm963_vm3, %v1085_v38  ;;  %v1200_v24 = vmul.f32 %v2396_v8, %v1084_v42  ;;  %v884_v11 = vadd.f32 %v883_v17, %v764_v10  ;;  %v1201_v32 = vmul.f32 %v2397_v16, %v1085_v38 }
 0x121   : > { %1102 = vst.msk [vmem:[%s2950_s26 + $0x58] sm:$0xff] %vm963_vm3, %v1084_v42  ;;  %v1205_v42 = vld [vmem:[#allocation3] sm:$0x1] }
 0x122   : > { %v1258_v29 = vmul.f32 %v1200_v24, %v1200_v24  ;;  %v1227_v34 = vsel %vm963_vm3, %v1200_v24, 0.0  ;;  %v1050_v36 = vadd.f32 %v2988_v27, %v884_v11  ;;  %v1203_v27 = vmul.f32 %v2399_v59, %v1087_v33 }
 0x123   : > { %v1228_v47 = vadd.f32 %v1227_v34, %v1226_v9  ;;  %v1259_v49 = vmul.f32 %v1201_v32, %v1201_v32  ;;  %v1229_v53 = vsel %vm963_vm3, %v1201_v32, 0.0 }
 0x124   : > { %v1284_v12 = vsel %vm963_vm3, %v1258_v29, 0.0  ;;  %v1070_v41 = vadd.f32 %v2941_v39, %v1050_v36  ;;  %v1261_v18 = vmul.f32 %v1203_v27, %v1203_v27  ;;  %v1233_v56 = vsel %vm963_vm3, %v1203_v27, 0.0 }
 0x125   : > { %v1285_v1 = vadd.f32 %v1284_v12, %v1283_v46  ;;  %v1230_v2 = vadd.f32 %v1229_v53, %v1228_v47  ;;  %v1286_v20 = vsel %vm963_vm3, %v1259_v49, 0.0 }
 0x126   : > { %v1086_v50 = vmax.f32 %v1070_v41, 0.0  ;;  %v1290_v30 = vsel %vm963_vm3, %v1261_v18, 0.0 }
 0x127   : > { %v1287_v44 = vadd.f32 %v1286_v20, %v1285_v1 }
 0x128   : > { %1104 = vst.msk [vmem:[%s2950_s26 + $0x68] sm:$0xff] %vm963_vm3, %v1086_v50  ;;  %v1202_v39 = vmul.f32 %v2398_v48, %v1086_v50 }
 0x12a   : > { %v1231_v51 = vsel %vm963_vm3, %v1202_v39, 0.0  ;;  %v1260_v54 = vmul.f32 %v1202_v39, %v1202_v39 }
 0x12b   : > { %v1232_v33 = vadd.f32 %v1231_v51, %v1230_v2 }
 0x12c   : > { %v1288_v57 = vsel %vm963_vm3, %v1260_v54, 0.0 }
 0x12d   : > { %v1234_v60 = vadd.f32 %v1233_v56, %v1232_v33  ;;  %v1289_v22 = vadd.f32 %v1288_v57, %v1287_v44 }
 0x12f   : > { %v1236_v28 = vadd.f32 %v1235_v26, %v1234_v60  ;;  %v1291_v45 = vadd.f32 %v1290_v30, %v1289_v22 }
 0x131   : > { %v1237_v63 = vrot.slane %v1236_v28, 4  ;;  %v1293_v0 = vadd.f32 %v1292_v62, %v1291_v45 }
 0x133   : > { %v1238_v3 = vadd.f32 %v1237_v63, %v1236_v28  ;;  %v1294_v5 = vrot.slane %v1293_v0, 4 }
 0x135   : > { %v1239_v61 = vrot.slane %v1238_v3, 2  ;;  %v1295_v19 = vadd.f32 %v1294_v5, %v1293_v0 }
 0x137   : > { %v1240_v7 = vadd.f32 %v1239_v61, %v1238_v3  ;;  %v1296_v8 = vrot.slane %v1295_v19, 2 }
 0x139   : > { %v1241_v35 = vrot.slane %v1240_v7, 1  ;;  %v1297_v38 = vadd.f32 %v1296_v8, %v1295_v19 }
 0x13b   : > { %v1242_v10 = vadd.f32 %v1241_v35, %v1240_v7  ;;  %v1298_v6 = vrot.slane %v1297_v38, 1 }
 0x13d   : > { %v1243_v14 = vadd.f32 %v1242_v10, %v1205_v42  ;;  %v1299_v15 = vadd.f32 %v1298_v6, %v1297_v38 }
 0x13f   : > { %1245 = vst.msk [vmem:[#allocation3] sm:$0x1] %vm1244_vm5, %v1243_v14  ;;  %v1300_v16 = vadd.f32 %v1299_v15, %v1246_v13 }
 0x141   : > { %1301 = vst.msk [vmem:[#allocation4] sm:$0x1] %vm1244_vm5, %v1300_v16 }
 0x142 PF: > { %p2401_p5 = scmp.ne.s32.totalorder %s2675_s24, 1 }
 0x143   : > { %s2402_s25 = sshll.u32 (!%p2401_p5), %s2671_s23, 7 }
 0x144   : > { %1305 = sbr.rel (%p2401_p5) target bundleno = 568 (0x238), region = 92  ;;  %s3173_s28 = scalar_lea.vmem (!%p2401_p5), [#allocation2], %s2402_s25 }
 0x149   : > { %v2485_v17 = vld [vmem:[%s3672_s9 + $0x8] sm:$0xff]  ;;  %v1324_v21 = vld [vmem:[#allocation3] sm:$0x1]  ;;  %v1325_v23 = vld [vmem:[#allocation4] sm:$0x1]  ;;  %vm1448_vm8 = vcmask 261120  }
 0x14a   : > { %1479 = vmatpush.bf16.msra.mxu0 %v2485_v17  ;;  %2492 = vmatpush.bf16.msra.mxu1 %v2485_v17  ;;  %v2484_v24 = vld [vmem:[%s3672_s9] sm:$0xff]  ;;  %v1328_v11 = vmul.f32 0.0033333334, %v1324_v21  ;;  %v1329_v37 = vmul.f32 0.0033333334, %v1325_v23  ;;  %v1309_v9 = vld [vmem:[%s3173_s28 + $0x8] sm:$0xff] }
 0x14b   : > { %2493 = vmatpush.bf16.msra.mxu2 %v2485_v17  ;;  %2494 = vmatpush.bf16.msra.mxu3 %v2485_v17  ;;  %v1308_v40 = vld [vmem:[%s3173_s28] sm:$0xff]  ;;  %v1313_v43 = vld [vmem:[%s3173_s28 + $0x28] sm:$0xff]  ;;  %v1310_v4 = vld [vmem:[%s3173_s28 + $0x10] sm:$0xff]  ;;  %vm1637_vm13 = vcmask 130048  }
 0x14c   : > { %v1330_v25 = vmul.f32 %v1328_v11, %v1328_v11  ;;  %v3169_v36 = vperm.slane %v1328_v11, 0  ;;  %v1312_v12 = vld [vmem:[%s3173_s28 + $0x20] sm:$0xff]  ;;  %v1317_v47 = vld [vmem:[%s3173_s28 + $0x48] sm:$0xff]  ;;  %v1311_v53 = vld [vmem:[%s3173_s28 + $0x18] sm:$0xff] }
 0x14d   : > { %v1316_v46 = vld [vmem:[%s3173_s28 + $0x40] sm:$0xff]  ;;  %v1321_v49 = vld [vmem:[%s3173_s28 + $0x68] sm:$0xff]  ;;  %v1314_v39 = vld [vmem:[%s3173_s28 + $0x30] sm:$0xff] }
 0x14e   : > { %1480 = vmatpush.bf16.msra.mxu0 %v2484_v24  ;;  %2495 = vmatpush.bf16.msra.mxu1 %v2484_v24  ;;  %v1331_v52 = vsub.f32 %v1329_v37, %v1330_v25  ;;  %v1320_v27 = vld [vmem:[%s3173_s28 + $0x60] sm:$0xff]  ;;  %v1336_v50 = vsub.f32 %v1308_v40, %v3169_v36  ;;  %v1337_v2 = vsub.f32 %v1309_v9, %v3169_v36  ;;  %v1315_v54 = vld [vmem:[%s3173_s28 + $0x38] sm:$0xff]  ;;  %v1318_v44 = vld [vmem:[%s3173_s28 + $0x50] sm:$0xff] }
 0x14f   : > { %2496 = vmatpush.bf16.msra.mxu2 %v2484_v24  ;;  %2497 = vmatpush.bf16.msra.mxu3 %v2484_v24  ;;  %v1340_v18 = vsub.f32 %v1312_v12, %v3169_v36  ;;  %v1341_v20 = vsub.f32 %v1313_v43, %v3169_v36  ;;  %v1344_v51 = vsub.f32 %v1316_v46, %v3169_v36  ;;  %v1319_v33 = vld [vmem:[%s3173_s28 + $0x58] sm:$0xff]  ;;  %v2578_v30 = vld [vmem:[%s3670_s7] ss:$0 sm:$0xff]  ;;  %v1322_v23 = vld [vmem:[%s3173_s28 + $0x70] sm:$0xff] }
 0x150   : > { %v1332_v55 = vmax.f32 %v1331_v52, 0.0  ;;  %v1345_v58 = vsub.f32 %v1317_v47, %v3169_v36  ;;  %v1348_v57 = vsub.f32 %v1320_v27, %v3169_v36  ;;  %v1349_v60 = vsub.f32 %v1321_v49, %v3169_v36  ;;  %v2579_v61 = vld [vmem:[%s3671_s8] ss:$0 sm:$0xff]  ;;  %v1323_v52 = vld [vmem:[%s3173_s28 + $0x78] sm:$0xff] }
 0x151   : > { %v1338_v26 = vsub.f32 %v1310_v4, %v3169_v36  ;;  %v1339_v28 = vsub.f32 %v1311_v53, %v3169_v36  ;;  %v1342_v45 = vsub.f32 %v1314_v39, %v3169_v36  ;;  %v1343_v62 = vsub.f32 %v1315_v54, %v3169_v36 }
 0x152   : > { %v1352_v29 = vadd.f32 1e-05, %v1332_v55  ;;  %v1346_v63 = vsub.f32 %v1318_v44, %v3169_v36  ;;  %v1347_v0 = vsub.f32 %v1319_v33, %v3169_v36  ;;  %v1350_v40 = vsub.f32 %v1322_v23, %v3169_v36 }
 0x153   : > { %v1351_v43 = vsub.f32 %v1323_v52, %v3169_v36 }
 0x154   : > { %2581 = vrsqrt.f32 %v1352_v29  ;;  %vm1359_vm3 = vweird.f32 %v1352_v29 }
 0x15a   : > { %v2582_v31 = vpop.eup %2581 }
 0x15b   : > { %v1354_v32 = vmul.f32 %v2582_v31, %v1352_v29  ;;  %vm1360_vm6 = vweird.f32 %v2582_v31 }
 0x15c   : > { %vm3181_vm7 = vmor %vm1359_vm3, %vm1360_vm6 }
 0x15d   : > { %v1355_v34 = vmul.f32 %v2582_v31, %v1354_v32 }
 0x15f   : > { %v1356_v59 = vmul.f32 0.5, %v1355_v34 }
 0x161   : > { %v1357_v41 = vsub.f32 1.5, %v1356_v59 }
 0x163   : > { %v1358_v1 = vmul.f32 %v2582_v31, %v1357_v41 }
 0x165   : > { %v1362_v56 = vsel %vm3181_vm7, %v2582_v31, %v1358_v1 }
 0x166   : > { %v1364_v22 = vperm.slane %v1362_v56, 0 }
 0x168   : > { %v1366_v3 = vmul.f32 %v1364_v22, %v1336_v50  ;;  %v1367_v5 = vmul.f32 %v1364_v22, %v1337_v2  ;;  %v1370_v19 = vmul.f32 %v1364_v22, %v1340_v18  ;;  %v1371_v7 = vmul.f32 %v1364_v22, %v1341_v20 }
 0x169   : > { %v1374_v8 = vmul.f32 %v1364_v22, %v1344_v51  ;;  %v1375_v35 = vmul.f32 %v1364_v22, %v1345_v58  ;;  %v1378_v38 = vmul.f32 %v1364_v22, %v1348_v57  ;;  %v1379_v42 = vmul.f32 %v1364_v22, %v1349_v60 }
 0x16a   : > { %v1385_v10 = vmul.f32 %v2578_v30, %v1366_v3  ;;  %v1386_v6 = vmul.f32 %v2578_v30, %v1367_v5  ;;  %v1389_v13 = vmul.f32 %v2578_v30, %v1370_v19  ;;  %v1390_v14 = vmul.f32 %v2578_v30, %v1371_v7 }
 0x16b   : > { %v1393_v15 = vmul.f32 %v2578_v30, %v1374_v8  ;;  %v1394_v16 = vmul.f32 %v2578_v30, %v1375_v35  ;;  %v1397_v17 = vmul.f32 %v2578_v30, %v1378_v38  ;;  %v1398_v21 = vmul.f32 %v2578_v30, %v1379_v42 }
 0x16c   : > { %v1404_v24 = vadd.f32 %v2579_v61, %v1385_v10  ;;  %v1405_v11 = vadd.f32 %v2579_v61, %v1386_v6  ;;  %v1408_v37 = vadd.f32 %v2579_v61, %v1389_v13  ;;  %v1409_v25 = vadd.f32 %v2579_v61, %v1390_v14  ;;  %v3248_v13 = vld [vmem:[%s3673_s10] ss:$0 sm:$0xff] }
 0x16d   : > { %v1412_v55 = vadd.f32 %v2579_v61, %v1393_v15  ;;  %v1413_v29 = vadd.f32 %v2579_v61, %v1394_v16  ;;  %v1416_v31 = vadd.f32 %v2579_v61, %v1397_v17  ;;  %v1417_v32 = vadd.f32 %v2579_v61, %v1398_v21 }
 0x16e   : > { %v1420_v34 = vpack.c.bf16 %v1405_v11, %v1404_v24  ;;  %v1422_v59 = vpack.c.bf16 %v1409_v25, %v1408_v37  ;;  %v1368_v41 = vmul.f32 %v1364_v22, %v1338_v26  ;;  %v1369_v46 = vmul.f32 %v1364_v22, %v1339_v28 }
 0x16f   : > { %v1424_v9 = vpack.c.bf16 %v1413_v29, %v1412_v55  ;;  %v1426_v12 = vpack.c.bf16 %v1417_v32, %v1416_v31  ;;  %v1372_v47 = vmul.f32 %v1364_v22, %v1342_v45  ;;  %v1373_v48 = vmul.f32 %v1364_v22, %v1343_v62 }
 0x170   : > { %2411 = vmatmul.msk.bf16.vlgmr.msra.gmra.mxu0 %vm1448_vm8, %v1420_v34  ;;  %2413 = vmatmul.msk.bf16.vlgmr.msra.gmra.mxu1 %vm1448_vm8, %v1422_v59  ;;  %v1376_v27 = vmul.f32 %v1364_v22, %v1346_v63  ;;  %v1377_v49 = vmul.f32 %v1364_v22, %v1347_v0  ;;  %v1380_v50 = vmul.f32 %v1364_v22, %v1350_v40  ;;  %v3231_v0 = vstv %s2402_s25 }
 0x171   : > { %2415 = vmatmul.msk.bf16.vlgmr.msra.gmra.mxu2 %vm1448_vm8, %v1424_v9  ;;  %2417 = vmatmul.msk.bf16.vlgmr.msra.gmra.mxu3 %vm1448_vm8, %v1426_v12  ;;  %v1381_v1 = vmul.f32 %v1364_v22, %v1351_v43  ;;  %v1387_v4 = vmul.f32 %v2578_v30, %v1368_v41  ;;  %v1388_v53 = vmul.f32 %v2578_v30, %v1369_v46  ;;  %v2691_v14 = vmov 0.0  }
 0x172   : > { %v1391_v39 = vmul.f32 %v2578_v30, %v1372_v47  ;;  %v1392_v2 = vmul.f32 %v2578_v30, %v1373_v48  ;;  %v1395_v36 = vmul.f32 %v2578_v30, %v1376_v27  ;;  %v1396_v18 = vmul.f32 %v2578_v30, %v1377_v49 }
 0x173   : > { %v1399_v20 = vmul.f32 %v2578_v30, %v1380_v50  ;;  %v1400_v51 = vmul.f32 %v2578_v30, %v1381_v1  ;;  %v1406_v54 = vadd.f32 %v2579_v61, %v1387_v4  ;;  %v1407_v44 = vadd.f32 %v2579_v61, %v1388_v53 }
 0x174   : > { %v1410_v33 = vadd.f32 %v2579_v61, %v1391_v39  ;;  %v1411_v56 = vadd.f32 %v2579_v61, %v1392_v2  ;;  %v1414_v58 = vadd.f32 %v2579_v61, %v1395_v36  ;;  %v1415_v57 = vadd.f32 %v2579_v61, %v1396_v18 }
 0x175   : > { %v1418_v60 = vadd.f32 %v2579_v61, %v1399_v20  ;;  %v1419_v26 = vadd.f32 %v2579_v61, %v1400_v51  ;;  %v1421_v28 = vpack.c.bf16 %v1407_v44, %v1406_v54  ;;  %v1538_v30 = vlaneseq }
 0x176   : > { %v1423_v45 = vpack.c.bf16 %v1411_v56, %v1410_v33  ;;  %v1425_v22 = vpack.c.bf16 %v1415_v57, %v1414_v58 }
 0x177   : > { %v1427_v62 = vpack.c.bf16 %v1419_v26, %v1418_v60  ;;  %v3227_v63 = vshrl.u32 %v1538_v30, 7 }
 0x179   : > { %v1556_v61 = vadd.s32 %v3231_v0, %v3227_v63  ;;  %v1543_v19 = vadd.s32 32, %v3227_v63  ;;  %v1540_v7 = vadd.s32 8, %v3227_v63  ;;  %v1544_v8 = vadd.s32 40, %v3227_v63 }
 0x17a   : > { %v1541_v38 = vadd.s32 16, %v3227_v63  ;;  %v1547_v23 = vadd.s32 64, %v3227_v63  ;;  %v1548_v11 = vadd.s32 72, %v3227_v63  ;;  %v1545_v37 = vadd.s32 48, %v3227_v63 }
 0x17b   : > { %vm1572_vm9 = vcmp.lt.s32.totalorder %v1556_v61, 300  ;;  %v1560_v35 = vadd.s32 %v3231_v0, %v1543_v19  ;;  %v1557_v42 = vadd.s32 %v3231_v0, %v1540_v7  ;;  %v1561_v21 = vadd.s32 %v3231_v0, %v1544_v8 }
 0x17c   : > { %v2419_v15 = vsel %vm1572_vm9, 1.0, %v2691_v14  ;;  %v1558_v24 = vadd.s32 %v3231_v0, %v1541_v38  ;;  %v1551_v25 = vadd.s32 96, %v3227_v63  ;;  %v1542_v52 = vadd.s32 24, %v3227_v63 }
 0x17d   : > { %vm1576_vm10 = vcmp.lt.s32.totalorder %v1560_v35, 300  ;;  %v1546_v55 = vadd.s32 56, %v3227_v63  ;;  %vm1573_vm11 = vcmp.lt.s32.totalorder %v1557_v42, 300  ;;  %v1549_v31 = vadd.s32 80, %v3227_v63 }
 0x17e   : > { %v1552_v32 = vadd.s32 104, %v3227_v63  ;;  %vm1577_vm12 = vcmp.lt.s32.totalorder %v1561_v21, 300  ;;  %v1550_v40 = vadd.s32 88, %v3227_v63  ;;  %v2423_v9 = vsel %vm1576_vm10, 1.0, %v2691_v14 }
 0x17f   : > { %v1564_v12 = vadd.s32 %v3231_v0, %v1547_v23  ;;  %vm1574_vm14 = vcmp.lt.s32.totalorder %v1558_v24, 300  ;;  %v1565_v41 = vadd.s32 %v3231_v0, %v1548_v11  ;;  %v1562_v43 = vadd.s32 %v3231_v0, %v1545_v37 }
 0x180   : > { %2412 = vmatmul.msk.bf16.gmra.mxu0 %vm1448_vm8, %v1421_v28  ;;  %2414 = vmatmul.msk.bf16.gmra.mxu1 %vm1448_vm8, %v1423_v45  ;;  %v1568_v46 = vadd.s32 %v3231_v0, %v1551_v25  ;;  %v1559_v47 = vadd.s32 %v3231_v0, %v1542_v52  ;;  %v1563_v48 = vadd.s32 %v3231_v0, %v1546_v55  ;;  %v2420_v49 = vsel %vm1573_vm11, 1.0, %v2691_v14 }
 0x181   : > { %2416 = vmatmul.msk.bf16.gmra.mxu2 %vm1448_vm8, %v1425_v22  ;;  %2418 = vmatmul.msk.bf16.gmra.mxu3 %vm1448_vm8, %v1427_v62  ;;  %v1566_v1 = vadd.s32 %v3231_v0, %v1549_v31  ;;  %v1569_v4 = vadd.s32 %v3231_v0, %v1552_v32  ;;  %v2424_v2 = vsel %vm1577_vm12, 1.0, %v2691_v14  ;;  %v1567_v20 = vadd.s32 %v3231_v0, %v1550_v40 }
 0x182   : > { %vm1580_vm15 = vcmp.lt.s32.totalorder %v1564_v12, 300  ;;  %v2421_v54 = vsel %vm1574_vm14, 1.0, %v2691_v14  ;;  %vm1581_vm0 = vcmp.lt.s32.totalorder %v1565_v41, 300  ;;  %vm1578_vm1 = vcmp.lt.s32.totalorder %v1562_v43, 300 }
 0x183   : > { %vm1584_vm2 = vcmp.lt.s32.totalorder %v1568_v46, 300  ;;  %vm1575_vm4 = vcmp.lt.s32.totalorder %v1559_v47, 300  ;;  %vm1579_vm5 = vcmp.lt.s32.totalorder %v1563_v48, 300  ;;  %vm1582_vm3 = vcmp.lt.s32.totalorder %v1566_v1, 300 }
 0x184   : > { %vm1585_vm6 = vcmp.lt.s32.totalorder %v1569_v4, 300  ;;  %vm1583_vm7 = vcmp.lt.s32.totalorder %v1567_v20, 300  ;;  %v2427_v26 = vsel %vm1580_vm15, 1.0, %v2691_v14  ;;  %v2425_v45 = vsel %vm1578_vm1, 1.0, %v2691_v14 }
 0x185   : > { %v3293_v22 = vsel %vm1581_vm0, 1.0, %v2691_v14  ;;  %v3297_v62 = vsel %vm1584_vm2, 1.0, %v2691_v14  ;;  %v2422_v30 = vsel %vm1575_vm4, 1.0, %v2691_v14  ;;  %v3309_v8 = vsel %vm1582_vm3, 1.0, %v2691_v14 }
 0x186   : > { %v3312_v35 = vsel %vm1583_vm7, 1.0, %v2691_v14  ;;  %v1554_v43 = vadd.s32 120, %v3227_v63  ;;  %vm1676_vm10 = vcmask 122880  }
 0x1ed   : > { %v1482_v3 = vpop.f32.mrf.mxu0  ;;  %v1492_v5 = vpop.f32.mrf.mxu1 }
 0x1ee   : > { %v1483_v34 = vadd.f32 %v3248_v13, %v1482_v3  ;;  %v1493_v59 = vadd.f32 %v3248_v13, %v1492_v5  ;;  %v2426_v3 = vsel %vm1579_vm5, 1.0, %v2691_v14  ;;  %v3304_v5 = vsel %vm1585_vm6, 1.0, %v2691_v14 }
 0x1f0   : > { %v1522_v53 = vmax.f32 %v1483_v34, 0.0  ;;  %v1526_v39 = vmax.f32 %v1493_v59, 0.0 }
 0x1f2   : > { %v1620_v58 = vmul.f32 %v2419_v15, %v1522_v53  ;;  %v1624_v57 = vmul.f32 %v2423_v9, %v1526_v39 }
 0x1f4   : > { %v3241_v10 = vpop.f32.mrf.mxu2  ;;  %v3243_v6 = vpop.f32.mrf.mxu3  ;;  %v1638_v38 = vsel %vm1637_vm13, %v1620_v58, 0.0  ;;  %v1679_v42 = vmul.f32 %v1620_v58, %v1620_v58  ;;  %v1645_v15 = vsel %vm1637_vm13, %v1624_v57, 0.0  ;;  %v1683_v25 = vmul.f32 %v1624_v57, %v1624_v57 }
 0x1f5   : > { %v1484_v16 = vpop.f32.mrf.mxu0  ;;  %v1494_v17 = vpop.f32.mrf.mxu1  ;;  %v1503_v52 = vadd.f32 %v3248_v13, %v3241_v10  ;;  %v3323_v55 = vadd.f32 %v3248_v13, %v3243_v6 }
 0x1f6   : > { %v1485_v29 = vadd.f32 %v3248_v13, %v1484_v16  ;;  %v1495_v60 = vadd.f32 %v3248_v13, %v1494_v17  ;;  %v1695_v40 = vsel %vm1637_vm13, %v1679_v42, 0.0  ;;  %v1702_v48 = vsel %vm1637_vm13, %v1683_v25, 0.0 }
 0x1f7   : > { %v1534_v20 = vmax.f32 %v3323_v55, 0.0 }
 0x1f8   : > { %v1523_v27 = vmax.f32 %v1485_v29, 0.0  ;;  %v1527_v16 = vmax.f32 %v1495_v60, 0.0  ;;  %v1553_v29 = vadd.s32 112, %v3227_v63 }
 0x1fa   : > { %v1621_v33 = vmul.f32 %v2420_v49, %v1523_v27  ;;  %v1625_v12 = vmul.f32 %v2424_v2, %v1527_v16  ;;  %v1530_v49 = vmax.f32 %v1503_v52, 0.0 }
 0x1fc   : > { %v3275_v50 = vpop.f32.mrf.mxu2  ;;  %v3285_v44 = vpop.f32.mrf.mxu3  ;;  %v1680_v61 = vmul.f32 %v1621_v33, %v1621_v33  ;;  %v1639_v23 = vsel %vm1637_vm13, %v1621_v33, 0.0  ;;  %v1684_v63 = vmul.f32 %v1625_v12, %v1625_v12  ;;  %v1628_v58 = vmul.f32 %v2427_v26, %v1530_v49 }
 0x1fd   : > { %v1487_v36 = vpop.f32.mrf.mxu0  ;;  %v1497_v18 = vpop.f32.mrf.mxu1  ;;  %v1640_v9 = vadd.f32 %v1639_v23, %v1638_v38  ;;  %v1505_v6 = vadd.f32 %v3248_v13, %v3275_v50 }
 0x1fe   : > { %v1488_v51 = vadd.f32 %v3248_v13, %v1487_v36  ;;  %v1498_v19 = vadd.f32 %v3248_v13, %v1497_v18  ;;  %v1696_v31 = vsel %vm1637_vm13, %v1680_v61, 0.0 }
 0x1ff   : > { %v1697_v27 = vadd.f32 %v1696_v31, %v1695_v40  ;;  %v1531_v50 = vmax.f32 %v1505_v6, 0.0  ;;  %v1632_v40 = vmul.f32 %v3297_v62, %v1534_v20 }
 0x200   : > { %v1524_v56 = vmax.f32 %v1488_v51, 0.0  ;;  %v1528_v34 = vmax.f32 %v1498_v19, 0.0  ;;  %v1571_v19 = vadd.s32 %v3231_v0, %v1554_v43 }
 0x201   : > { %v1629_v26 = vmul.f32 %v3293_v22, %v1531_v50 }
 0x202   : > { %v1622_v28 = vmul.f32 %v2421_v54, %v1524_v56  ;;  %v1626_v4 = vmul.f32 %v2425_v45, %v1528_v34  ;;  %v1647_v45 = vsel %vm1637_vm13, %v1625_v12, 0.0  ;;  %vm1587_vm9 = vcmp.lt.s32.totalorder %v1571_v19, 300 }
 0x203   : > { %v1688_v31 = vmul.f32 %v1629_v26, %v1629_v26 }
 0x204   : > { %v1507_v7 = vpop.f32.mrf.mxu2  ;;  %v1681_v24 = vmul.f32 %v1622_v28, %v1622_v28  ;;  %v1641_v32 = vsel %vm1637_vm13, %v1622_v28, 0.0  ;;  %v1517_v41 = vpop.f32.mrf.mxu3  ;;  %v1570_v28 = vadd.s32 %v3231_v0, %v1553_v29  ;;  %v1649_v16 = vsel %vm1637_vm13, %v1626_v4, 0.0 }
 0x205   : > { %v1489_v17 = vpop.f32.mrf.mxu0  ;;  %v1499_v21 = vpop.f32.mrf.mxu1  ;;  %v1642_v1 = vadd.f32 %v1641_v32, %v1640_v9  ;;  %v1508_v2 = vadd.f32 %v3248_v13, %v1507_v7  ;;  %v1704_v7 = vsel %vm1637_vm13, %v1684_v63, 0.0  ;;  %v1518_v52 = vadd.f32 %v3248_v13, %v1517_v41 }
 0x206   : > { %v1490_v11 = vadd.f32 %v3248_v13, %v1489_v17  ;;  %v1500_v37 = vadd.f32 %v3248_v13, %v1499_v21  ;;  %v1698_v10 = vsel %vm1637_vm13, %v1681_v24, 0.0  ;;  %v1687_v21 = vmul.f32 %v1628_v58, %v1628_v58 }
 0x207   : > { %v1699_v18 = vadd.f32 %v1698_v10, %v1697_v27  ;;  %v1532_v61 = vmax.f32 %v1508_v2, 0.0  ;;  %vm1586_vm8 = vcmp.lt.s32.totalorder %v1570_v28, 300  ;;  %v1655_v41 = vsel %vm1637_vm13, %v1629_v26, 0.0 }
 0x208   : > { %v1525_v59 = vmax.f32 %v1490_v11, 0.0  ;;  %v1529_v47 = vmax.f32 %v1500_v37, 0.0  ;;  %v1536_v10 = vmax.f32 %v1518_v52, 0.0  ;;  %v1636_v52 = vld [vmem:[#allocation5] sm:$0x1] }
 0x209   : > { %v1630_v25 = vmul.f32 %v3309_v8, %v1532_v61  ;;  %v1710_v8 = vsel %vm1637_vm13, %v1687_v21, 0.0 }
 0x20a   : > { %v1623_v46 = vmul.f32 %v2422_v30, %v1525_v59  ;;  %v1627_v33 = vmul.f32 %v2426_v3, %v1529_v47  ;;  %v1685_v30 = vmul.f32 %v1626_v4, %v1626_v4  ;;  %v1515_v3 = vadd.f32 %v3248_v13, %v3285_v44 }
 0x20b   : > { %v1653_v44 = vsel %vm1637_vm13, %v1628_v58, 0.0  ;;  %v1689_v43 = vmul.f32 %v1630_v25, %v1630_v25  ;;  %v1657_v62 = vsel %vm1637_vm13, %v1630_v25, 0.0  ;;  %v2434_v4 = vsel %vm1587_vm9, 1.0, %v2691_v14 }
 0x20c   : > { %v1643_v53 = vsel %vm1637_vm13, %v1623_v46, 0.0  ;;  %v1682_v39 = vmul.f32 %v1623_v46, %v1623_v46  ;;  %v1509_v36 = vpop.f32.mrf.mxu2  ;;  %v1519_v11 = vpop.f32.mrf.mxu3  ;;  %v1706_v0 = vsel %vm1637_vm13, %v1685_v30, 0.0  ;;  %v1651_v37 = vsel %vm1637_vm13, %v1627_v33, 0.0 }
 0x20d   : > { %v1644_v51 = vadd.f32 %v1643_v53, %v1642_v1  ;;  %v1510_v56 = vadd.f32 %v3248_v13, %v1509_v36  ;;  %v1535_v22 = vmax.f32 %v1515_v3, 0.0  ;;  %v1520_v59 = vadd.f32 %v3248_v13, %v1519_v11 }
 0x20e   : > { %v1700_v54 = vsel %vm1637_vm13, %v1682_v39, 0.0  ;;  %v1712_v13 = vsel %vm1637_vm13, %v1688_v31, 0.0  ;;  %v1691_v53 = vmul.f32 %v1632_v40, %v1632_v40  ;;  %v1714_v39 = vsel %vm1637_vm13, %v1689_v43, 0.0 }
 0x20f   : > { %v1646_v57 = vadd.f32 %v1645_v15, %v1644_v51  ;;  %v1701_v60 = vadd.f32 %v1700_v54, %v1699_v18  ;;  %v1686_v15 = vmul.f32 %v1627_v33, %v1627_v33  ;;  %v1533_v17 = vmax.f32 %v1510_v56, 0.0 }
 0x210   : > { %v1633_v47 = vmul.f32 %v3304_v5, %v1535_v22  ;;  %v1537_v27 = vmax.f32 %v1520_v59, 0.0  ;;  %v1661_v18 = vsel %vm1637_vm13, %v1632_v40, 0.0  ;;  %v1718_v56 = vsel %vm1637_vm13, %v1691_v53, 0.0 }
 0x211   : > { %v1703_v38 = vadd.f32 %v1702_v48, %v1701_v60  ;;  %v1648_v42 = vadd.f32 %v1647_v45, %v1646_v57  ;;  %v1708_v32 = vsel %vm1637_vm13, %v1686_v15, 0.0  ;;  %v1631_v34 = vmul.f32 %v3312_v35, %v1533_v17 }
 0x212   : > { %v2433_v35 = vsel %vm1586_vm8, 1.0, %v2691_v14  ;;  %v1692_v20 = vmul.f32 %v1633_v47, %v1633_v47  ;;  %v1635_v50 = vmul.f32 %v2434_v4, %v1537_v27  ;;  %v1663_v14 = vsel %vm1637_vm13, %v1633_v47, 0.0 }
 0x213   : > { %v1650_v23 = vadd.f32 %v1649_v16, %v1648_v42  ;;  %v1705_v24 = vadd.f32 %v1704_v7, %v1703_v38  ;;  %v1690_v48 = vmul.f32 %v1631_v34, %v1631_v34  ;;  %v1659_v2 = vsel %vm1637_vm13, %v1631_v34, 0.0 }
 0x214   : > { %v1634_v36 = vmul.f32 %v2433_v35, %v1536_v10  ;;  %v1720_v28 = vsel %vm1637_vm13, %v1692_v20, 0.0  ;;  %v1694_v30 = vmul.f32 %v1635_v50, %v1635_v50  ;;  %v1667_v38 = vsel %vm1637_vm13, %v1635_v50, 0.0 }
 0x215   : > { %v1652_v55 = vadd.f32 %v1651_v37, %v1650_v23  ;;  %v1707_v29 = vadd.f32 %v1706_v0, %v1705_v24  ;;  %v1716_v51 = vsel %vm1637_vm13, %v1690_v48, 0.0 }
 0x216   : > { %v1693_v58 = vmul.f32 %v1634_v36, %v1634_v36  ;;  %v1665_v45 = vsel %vm1637_vm13, %v1634_v36, 0.0  ;;  %v1724_v16 = vsel %vm1637_vm13, %v1694_v30, 0.0 }
 0x217   : > { %v1654_v9 = vadd.f32 %v1653_v44, %v1652_v55  ;;  %v1709_v12 = vadd.f32 %v1708_v32, %v1707_v29  ;;  %v1678_v29 = vld [vmem:[#allocation6] sm:$0x1] }
 0x218   : > { %v1722_v7 = vsel %vm1637_vm13, %v1693_v58, 0.0 }
 0x219   : > { %v1711_v6 = vadd.f32 %v1710_v8, %v1709_v12  ;;  %v1656_v46 = vadd.f32 %v1655_v41, %v1654_v9 }
 0x21b   : > { %v1658_v49 = vadd.f32 %v1657_v62, %v1656_v46  ;;  %v1713_v1 = vadd.f32 %v1712_v13, %v1711_v6 }
 0x21d   : > { %v1715_v5 = vadd.f32 %v1714_v39, %v1713_v1  ;;  %v1660_v63 = vadd.f32 %v1659_v2, %v1658_v49 }
 0x21f   : > { %v1662_v54 = vadd.f32 %v1661_v18, %v1660_v63  ;;  %v1717_v33 = vadd.f32 %v1716_v51, %v1715_v5 }
 0x221   : > { %v1719_v57 = vadd.f32 %v1718_v56, %v1717_v33  ;;  %v1664_v60 = vadd.f32 %v1663_v14, %v1662_v54 }
 0x223   : > { %v1666_v61 = vadd.f32 %v1665_v45, %v1664_v60  ;;  %v1721_v19 = vadd.f32 %v1720_v28, %v1719_v57 }
 0x225   : > { %v1723_v42 = vadd.f32 %v1722_v7, %v1721_v19  ;;  %v1668_v3 = vadd.f32 %v1667_v38, %v1666_v61 }
 0x227   : > { %v1669_v26 = vrot.slane %v1668_v3, 4  ;;  %v1725_v15 = vadd.f32 %v1724_v16, %v1723_v42 }
 0x229   : > { %v1670_v17 = vadd.f32 %v1669_v26, %v1668_v3  ;;  %v1726_v21 = vrot.slane %v1725_v15, 4 }
 0x22b   : > { %v1671_v23 = vrot.slane %v1670_v17, 2  ;;  %v1727_v24 = vadd.f32 %v1726_v21, %v1725_v15 }
 0x22d   : > { %v1672_v11 = vadd.f32 %v1671_v23, %v1670_v17  ;;  %v1728_v0 = vrot.slane %v1727_v24, 2 }
 0x22f   : > { %v1673_v37 = vrot.slane %v1672_v11, 1  ;;  %v1729_v25 = vadd.f32 %v1728_v0, %v1727_v24 }
 0x231   : > { %v1674_v44 = vadd.f32 %v1673_v37, %v1672_v11  ;;  %v1730_v55 = vrot.slane %v1729_v25, 1 }
 0x233   : > { %v1675_v22 = vadd.f32 %v1674_v44, %v1636_v52  ;;  %v1731_v31 = vadd.f32 %v1730_v55, %v1729_v25 }
 0x235   : > { %1677 = vst.msk [vmem:[#allocation5] sm:$0x1] %vm1676_vm10, %v1675_v22  ;;  %v1732_v32 = vadd.f32 %v1731_v31, %v1678_v29 }
 0x237   : > { %1733 = vst.msk [vmem:[#allocation6] sm:$0x1] %vm1676_vm10, %v1732_v32 }
 0x238 PF: > { %p2435_p6 = scmp.ne.s32.totalorder %s2675_s24, 2 }
 0x239   : > { %s2436_s25 = sshll.u32 (!%p2435_p6), %s2671_s23, 7 }
 0x23a   : > { %1737 = sbr.rel (%p2435_p6) target bundleno = 1014 (0x3f6), region = 96  ;;  %s3385_s28 = scalar_lea.vmem (!%p2435_p6), [#allocation2], %s2436_s25 }
 0x23f   : > { %v2487_v34 = vld [vmem:[%s3672_s9 + $0x8] sm:$0xff]  ;;  %v1756_v59 = vld [vmem:[#allocation3] sm:$0x1]  ;;  %v1757_v40 = vld [vmem:[#allocation4] sm:$0x1]  ;;  %vm1880_vm14 = vcmask 261120  }
 0x240   : > { %2499 = vmatpush.bf16.msra.mxu3 %v2487_v34  ;;  %v2486_v9 = vld [vmem:[%s3672_s9] sm:$0xff]  ;;  %v1760_v12 = vmul.f32 0.0033333334, %v1756_v59  ;;  %1911 = vmatpush.bf16.msra.mxu0 %v2487_v34  ;;  %v1761_v8 = vmul.f32 0.0033333334, %v1757_v40  ;;  %v1749_v27 = vld [vmem:[%s3385_s28 + $0x48] sm:$0xff] }
 0x241   : > { %2498 = vmatpush.bf16.msra.mxu2 %v2487_v34  ;;  %v1748_v48 = vld [vmem:[%s3385_s28 + $0x40] sm:$0xff]  ;;  %v1750_v20 = vld [vmem:[%s3385_s28 + $0x50] sm:$0xff]  ;;  %v1751_v51 = vld [vmem:[%s3385_s28 + $0x58] sm:$0xff]  ;;  %vm2075_vm2 = vcmask 130048  }
 0x242   : > { %v1762_v41 = vmul.f32 %v1760_v12, %v1760_v12  ;;  %v3383_v62 = vperm.slane %v1760_v12, 0  ;;  %v3396_v36 = vld [vmem:[%s3670_s7] ss:$0 sm:$0xff]  ;;  %v1753_v38 = vld [vmem:[%s3385_s28 + $0x68] sm:$0xff]  ;;  %v1742_v52 = vld [vmem:[%s3385_s28 + $0x10] sm:$0xff] }
 0x243   : > { %v3403_v18 = vld [vmem:[%s3671_s8] ss:$0 sm:$0xff]  ;;  %v1741_v16 = vld [vmem:[%s3385_s28 + $0x8] sm:$0xff]  ;;  %v1743_v44 = vld [vmem:[%s3385_s28 + $0x18] sm:$0xff] }
 0x244   : > { %2501 = vmatpush.bf16.msra.mxu3 %v2486_v9  ;;  %v1763_v43 = vsub.f32 %v1761_v8, %v1762_v41  ;;  %1912 = vmatpush.bf16.msra.mxu0 %v2486_v9  ;;  %v1776_v4 = vsub.f32 %v1748_v48, %v3383_v62  ;;  %v1777_v53 = vsub.f32 %v1749_v27, %v3383_v62  ;;  %v1752_v7 = vld [vmem:[%s3385_s28 + $0x60] sm:$0xff]  ;;  %v1746_v55 = vld [vmem:[%s3385_s28 + $0x30] sm:$0xff]  ;;  %v1747_v22 = vld [vmem:[%s3385_s28 + $0x38] sm:$0xff] }
 0x245   : > { %2500 = vmatpush.bf16.msra.mxu2 %v2486_v9  ;;  %v1778_v14 = vsub.f32 %v1750_v20, %v3383_v62  ;;  %v1779_v58 = vsub.f32 %v1751_v51, %v3383_v62  ;;  %v1780_v42 = vsub.f32 %v1752_v7, %v3383_v62  ;;  %v1740_v3 = vld [vmem:[%s3385_s28] sm:$0xff]  ;;  %v1781_v15 = vsub.f32 %v1753_v38, %v3383_v62 }
 0x246   : > { %v1764_v10 = vmax.f32 %v1763_v43, 0.0  ;;  %v1768_v17 = vsub.f32 %v1740_v3, %v3383_v62  ;;  %v1769_v21 = vsub.f32 %v1741_v16, %v3383_v62  ;;  %v1770_v29 = vsub.f32 %v1742_v52, %v3383_v62 }
 0x247   : > { %v1774_v31 = vsub.f32 %v1746_v55, %v3383_v62  ;;  %v1771_v59 = vsub.f32 %v1743_v44, %v3383_v62  ;;  %v1775_v40 = vsub.f32 %v1747_v22, %v3383_v62 }
 0x248   : > { %v1784_v6 = vadd.f32 1e-05, %v1764_v10 }
 0x24a   : > { %2589 = vrsqrt.f32 %v1784_v6  ;;  %vm1791_vm11 = vweird.f32 %v1784_v6 }
 0x250   : > { %v2590_v46 = vpop.eup %2589 }
 0x251   : > { %v1786_v47 = vmul.f32 %v2590_v46, %v1784_v6  ;;  %vm1792_vm12 = vweird.f32 %v2590_v46 }
 0x252   : > { %vm1793_vm13 = vmor %vm1791_vm11, %vm1792_vm12 }
 0x253   : > { %v1787_v35 = vmul.f32 %v2590_v46, %v1786_v47 }
 0x255   : > { %v1788_v13 = vmul.f32 0.5, %v1787_v35 }
 0x257   : > { %v1789_v49 = vsub.f32 1.5, %v1788_v13 }
 0x259   : > { %v1790_v1 = vmul.f32 %v2590_v46, %v1789_v49  ;;  %v1754_v49 = vld [vmem:[%s3385_s28 + $0x70] sm:$0xff] }
 0x25b   : > { %v1794_v39 = vsel %vm1793_vm13, %v2590_v46, %v1790_v1  ;;  %v1755_v1 = vld [vmem:[%s3385_s28 + $0x78] sm:$0xff] }
 0x25c   : > { %v3391_v2 = vperm.slane %v1794_v39, 0  ;;  %v1783_v20 = vsub.f32 %v1755_v1, %v3383_v62 }
 0x25e   : > { %v1806_v5 = vmul.f32 %v3391_v2, %v1776_v4  ;;  %v1807_v63 = vmul.f32 %v3391_v2, %v1777_v53  ;;  %v1808_v60 = vmul.f32 %v3391_v2, %v1778_v14  ;;  %v1809_v28 = vmul.f32 %v3391_v2, %v1779_v58 }
 0x25f   : > { %v1798_v23 = vmul.f32 %v3391_v2, %v1768_v17  ;;  %v1799_v24 = vmul.f32 %v3391_v2, %v1769_v21  ;;  %v1810_v11 = vmul.f32 %v3391_v2, %v1780_v42  ;;  %v1811_v0 = vmul.f32 %v3391_v2, %v1781_v15  ;;  %v1970_v15 = vld [vmem:[#allocation5] sm:$0x1]  ;;  %v1971_v17 = vld [vmem:[#allocation6] sm:$0x1] }
 0x260   : > { %v1825_v50 = vmul.f32 %v3396_v36, %v1806_v5  ;;  %v1826_v54 = vmul.f32 %v3396_v36, %v1807_v63  ;;  %v1827_v45 = vmul.f32 %v3396_v36, %v1808_v60  ;;  %v1828_v30 = vmul.f32 %v3396_v36, %v1809_v28 }
 0x261   : > { %v1817_v37 = vmul.f32 %v3396_v36, %v1798_v23  ;;  %v1818_v25 = vmul.f32 %v3396_v36, %v1799_v24  ;;  %v1804_v9 = vmul.f32 %v3391_v2, %v1774_v31  ;;  %v1829_v12 = vmul.f32 %v3396_v36, %v1810_v11 }
 0x262   : > { %v1844_v33 = vadd.f32 %v3403_v18, %v1825_v50  ;;  %v1845_v56 = vadd.f32 %v3403_v18, %v1826_v54  ;;  %v1846_v61 = vadd.f32 %v3403_v18, %v1827_v45  ;;  %v1847_v19 = vadd.f32 %v3403_v18, %v1828_v30  ;;  %v1744_v54 = vld [vmem:[%s3385_s28 + $0x20] sm:$0xff] }
 0x263   : > { %v1836_v32 = vadd.f32 %v3403_v18, %v1817_v37  ;;  %v1837_v34 = vadd.f32 %v3403_v18, %v1818_v25  ;;  %v1830_v8 = vmul.f32 %v3396_v36, %v1811_v0  ;;  %v1805_v43 = vmul.f32 %v3391_v2, %v1775_v40 }
 0x264   : > { %v1856_v57 = vpack.c.bf16 %v1845_v56, %v1844_v33  ;;  %v1857_v26 = vpack.c.bf16 %v1847_v19, %v1846_v61  ;;  %v1823_v10 = vmul.f32 %v3396_v36, %v1804_v9  ;;  %v1800_v6 = vmul.f32 %v3391_v2, %v1770_v29  ;;  %v1745_v33 = vld [vmem:[%s3385_s28 + $0x28] sm:$0xff] }
 0x265   : > { %v1852_v41 = vpack.c.bf16 %v1837_v34, %v1836_v32  ;;  %v1801_v46 = vmul.f32 %v3391_v2, %v1771_v59  ;;  %v1824_v47 = vmul.f32 %v3396_v36, %v1805_v43  ;;  %v1848_v13 = vadd.f32 %v3403_v18, %v1829_v12  ;;  %v3503_v43 = vld [vmem:[%s3674_s11] ss:$0 sm:$0xff] }
 0x266   : > { %2449 = vmatmul.msk.bf16.vlgmr.msra.gmra.mxu3 %vm1880_vm14, %v1856_v57  ;;  %v1842_v35 = vadd.f32 %v3403_v18, %v1823_v10  ;;  %v1849_v48 = vadd.f32 %v3403_v18, %v1830_v8  ;;  %v1819_v4 = vmul.f32 %v3396_v36, %v1800_v6  ;;  %v1782_v63 = vsub.f32 %v1754_v49, %v3383_v62 }
 0x267   : > { %2445 = vmatmul.msk.bf16.vlgmr.msra.gmra.mxu0 %vm1880_vm14, %v1852_v41  ;;  %v1843_v27 = vadd.f32 %v3403_v18, %v1824_v47  ;;  %v1820_v53 = vmul.f32 %v3396_v36, %v1801_v46  ;;  %v1813_v14 = vmul.f32 %v3391_v2, %v1783_v20  ;;  %v1772_v57 = vsub.f32 %v1744_v54, %v3383_v62  ;;  %v3510_v46 = vld [vmem:[%s3675_s12] ss:$0 sm:$0xff] }
 0x268   : > { %v1858_v5 = vpack.c.bf16 %v1849_v48, %v1848_v13  ;;  %v1838_v51 = vadd.f32 %v3403_v18, %v1819_v4  ;;  %v1812_v56 = vmul.f32 %v3391_v2, %v1782_v63  ;;  %v1773_v60 = vsub.f32 %v1745_v33, %v3383_v62 }
 0x269   : > { %v1855_v39 = vpack.c.bf16 %v1843_v27, %v1842_v35  ;;  %v1839_v50 = vadd.f32 %v3403_v18, %v1820_v53  ;;  %v1832_v45 = vmul.f32 %v3396_v36, %v1813_v14  ;;  %v1802_v30 = vmul.f32 %v3391_v2, %v1772_v57 }
 0x26a   : > { %v1831_v28 = vmul.f32 %v3396_v36, %v1812_v56  ;;  %v1803_v61 = vmul.f32 %v3391_v2, %v1773_v60  ;;  %v1974_v2 = vmul.f32 0.0033333334, %v1970_v15  ;;  %v1975_v21 = vmul.f32 0.0033333334, %v1971_v17 }
 0x26b   : > { %2448 = vmatmul.msk.bf16.vlgmr.msra.gmra.mxu2 %vm1880_vm14, %v1855_v39  ;;  %v1853_v58 = vpack.c.bf16 %v1839_v50, %v1838_v51  ;;  %v1851_v7 = vadd.f32 %v3403_v18, %v1832_v45  ;;  %v1821_v38 = vmul.f32 %v3396_v36, %v1802_v30 }
 0x26c   : > { %v1850_v19 = vadd.f32 %v3403_v18, %v1831_v28  ;;  %v1822_v42 = vmul.f32 %v3396_v36, %v1803_v61  ;;  %v1976_v23 = vmul.f32 %v1974_v2, %v1974_v2  ;;  %v3493_v32 = vperm.slane %v1974_v2, 0 }
 0x26d   : > { %v1840_v62 = vadd.f32 %v3403_v18, %v1821_v38 }
 0x26e   : > { %v1859_v3 = vpack.c.bf16 %v1851_v7, %v1850_v19  ;;  %v1841_v16 = vadd.f32 %v3403_v18, %v1822_v42  ;;  %v1977_v24 = vsub.f32 %v1975_v21, %v1976_v23  ;;  %v3490_v18 = vld [vmem:[%s3673_s10] ss:$0 sm:$0xff] }
 0x270   : > { %v1978_v11 = vmax.f32 %v1977_v24, 0.0 }
 0x272   : > { %v1998_v0 = vadd.f32 1e-05, %v1978_v11 }
 0x274   : > { %2591 = vrsqrt.f32 %v1998_v0  ;;  %vm2005_vm15 = vweird.f32 %v1998_v0 }
 0x276   : > { %2450 = vmatmul.msk.bf16.gmra.mxu3 %vm1880_vm14, %v1857_v26  ;;  %v1854_v26 = vpack.c.bf16 %v1841_v16, %v1840_v62 }
 0x277   : > { %2446 = vmatmul.msk.bf16.gmra.mxu0 %vm1880_vm14, %v1853_v58 }
 0x27a   : > { %v2592_v36 = vpop.eup %2591 }
 0x27b   : > { %v2000_v37 = vmul.f32 %v2592_v36, %v1998_v0  ;;  %vm2006_vm0 = vweird.f32 %v2592_v36 }
 0x27c   : > { %vm2007_vm1 = vmor %vm2005_vm15, %vm2006_vm0 }
 0x27d   : > { %v2001_v25 = vmul.f32 %v2592_v36, %v2000_v37 }
 0x27f   : > { %v2002_v52 = vmul.f32 0.5, %v2001_v25 }
 0x281   : > { %v2003_v44 = vsub.f32 1.5, %v2002_v52 }
 0x283   : > { %v2004_v29 = vmul.f32 %v2592_v36, %v2003_v44 }
 0x285   : > { %v2008_v34 = vsel %vm2007_vm1, %v2592_v36, %v2004_v29 }
 0x286   : > { %2451 = vmatmul.msk.bf16.gmra.mxu3 %vm1880_vm14, %v1858_v5  ;;  %v3496_v40 = vperm.slane %v2008_v34, 0 }
 0x287   : > { %2447 = vmatmul.msk.bf16.gmra.mxu0 %vm1880_vm14, %v1854_v26 }
 0x296   : > { %2452 = vmatmul.msk.bf16.gmra.mxu3 %vm1880_vm14, %v1859_v3 }
 0x2e4   : > { %v3522_v4 = vpop.f32.mrf.mxu0 }
 0x2e9   : > { %v1934_v55 = vpop.f32.mrf.mxu3 }
 0x2ea   : > { %v1935_v22 = vadd.f32 %v3490_v18, %v1934_v55 }
 0x2ec   : > { %v1962_v31 = vmax.f32 %v1935_v22, 0.0  ;;  %v3524_v5 = vpop.f32.mrf.mxu0 }
 0x2ee   : > { %v1990_v59 = vsub.f32 %v1962_v31, %v3493_v32  ;;  %v1929_v3 = vpop.f32.mrf.mxu2 }
 0x2f0   : > { %v2020_v8 = vmul.f32 %v3496_v40, %v1990_v59  ;;  %v1930_v59 = vadd.f32 %v3490_v18, %v1929_v3 }
 0x2f1   : > { %v1936_v9 = vpop.f32.mrf.mxu3 }
 0x2f2   : > { %v1937_v12 = vadd.f32 %v3490_v18, %v1936_v9  ;;  %v2039_v47 = vmul.f32 %v3503_v43, %v2020_v8 }
 0x2f4   : > { %v1963_v41 = vmax.f32 %v1937_v12, 0.0  ;;  %v3515_v48 = vadd.f32 %v3510_v46, %v2039_v47  ;;  %v3527_v51 = vpop.f32.mrf.mxu0 }
 0x2f6   : > { %v1991_v10 = vsub.f32 %v1963_v41, %v3493_v32  ;;  %v1931_v22 = vpop.f32.mrf.mxu2 }
 0x2f7   : > { %v1932_v9 = vadd.f32 %v3490_v18, %v1931_v22 }
 0x2f8   : > { %v2021_v6 = vmul.f32 %v3496_v40, %v1991_v10  ;;  %v1960_v10 = vmax.f32 %v1930_v59, 0.0 }
 0x2f9   : > { %v1939_v35 = vpop.f32.mrf.mxu3 }
 0x2fa   : > { %v2040_v13 = vmul.f32 %v3503_v43, %v2021_v6  ;;  %v1940_v7 = vadd.f32 %v3490_v18, %v1939_v35  ;;  %v1961_v6 = vmax.f32 %v1932_v9, 0.0 }
 0x2fc   : > { %v3518_v27 = vadd.f32 %v3510_v46, %v2040_v13  ;;  %v1921_v19 = vpop.f32.mrf.mxu0  ;;  %v1964_v2 = vmax.f32 %v1940_v7, 0.0 }
 0x2fe   : > { %v2071_v49 = vpack.c.bf16 %v3518_v27, %v3515_v48  ;;  %v1992_v36 = vsub.f32 %v1964_v2, %v3493_v32 }
 0x300   : > { %v2022_v31 = vmul.f32 %v3496_v40, %v1992_v36 }
 0x301   : > { %v1941_v1 = vpop.f32.mrf.mxu3 }
 0x302   : > { %v1942_v28 = vadd.f32 %v3490_v18, %v1941_v1  ;;  %v2041_v41 = vmul.f32 %v3503_v43, %v2022_v31 }
 0x304   : > { %v1965_v62 = vmax.f32 %v1942_v28, 0.0  ;;  %v1924_v52 = vpop.f32.mrf.mxu0  ;;  %v2060_v1 = vadd.f32 %v3510_v46, %v2041_v41 }
 0x306   : > { %v1993_v23 = vsub.f32 %v1965_v62, %v3493_v32 }
 0x308   : > { %v2023_v44 = vmul.f32 %v3496_v40, %v1993_v23 }
 0x309   : > { %v1944_v53 = vpop.f32.mrf.mxu3 }
 0x30a   : > { %v1945_v33 = vadd.f32 %v3490_v18, %v1944_v53  ;;  %v2042_v8 = vmul.f32 %v3503_v43, %v2023_v44  ;;  %v1988_v53 = vsub.f32 %v1960_v10, %v3493_v32 }
 0x30c   : > { %v1966_v57 = vmax.f32 %v1945_v33, 0.0  ;;  %v2061_v35 = vadd.f32 %v3510_v46, %v2042_v8  ;;  %v1926_v13 = vpop.f32.mrf.mxu0 }
 0x30e   : > { %v1994_v38 = vsub.f32 %v1966_v57, %v3493_v32  ;;  %v1920_v57 = vadd.f32 %v3490_v18, %v3527_v51 }
 0x310   : > { %v2024_v17 = vmul.f32 %v3496_v40, %v1994_v38  ;;  %v1956_v7 = vmax.f32 %v1920_v57, 0.0 }
 0x311   : > { %v1946_v39 = vpop.f32.mrf.mxu3 }
 0x312   : > { %v1947_v50 = vadd.f32 %v3490_v18, %v1946_v39  ;;  %v2043_v25 = vmul.f32 %v3503_v43, %v2024_v17  ;;  %v1925_v39 = vadd.f32 %v3490_v18, %v1924_v52 }
 0x314   : > { %v1967_v56 = vmax.f32 %v1947_v50, 0.0  ;;  %v2062_v34 = vadd.f32 %v3510_v46, %v2043_v25  ;;  %v2072_v50 = vpack.c.bf16 %v2061_v35, %v2060_v1  ;;  %v1958_v33 = vmax.f32 %v1925_v39, 0.0 }
 0x316   : > { %v1995_v45 = vsub.f32 %v1967_v56, %v3493_v32  ;;  %v1986_v28 = vsub.f32 %v1958_v33, %v3493_v32 }
 0x318   : > { %v2025_v16 = vmul.f32 %v3496_v40, %v1995_v45  ;;  %v2016_v3 = vmul.f32 %v3496_v40, %v1986_v28 }
 0x319   : > { %v1949_v63 = vpop.f32.mrf.mxu3 }
 0x31a   : > { %v1950_v20 = vadd.f32 %v3490_v18, %v1949_v63  ;;  %v2044_v0 = vmul.f32 %v3503_v43, %v2025_v16  ;;  %v1989_v63 = vsub.f32 %v1961_v6, %v3493_v32  ;;  %v1915_v16 = vadd.f32 %v3490_v18, %v3522_v4  ;;  %v2066_v6 = vld [vmem:[%s3676_s13] sm:$0xf] }
 0x31c   : > { %v1968_v54 = vmax.f32 %v1950_v20, 0.0  ;;  %v2063_v29 = vadd.f32 %v3510_v46, %v2044_v0  ;;  %v1927_v20 = vadd.f32 %v3490_v18, %v1926_v13  ;;  %v2019_v56 = vmul.f32 %v3496_v40, %v1989_v63 }
 0x31d   : > { %v1954_v17 = vmax.f32 %v1915_v16, 0.0  ;;  %v2692_v0 = vmov 0  }
 0x31e   : > { %v1996_v14 = vsub.f32 %v1968_v54, %v3493_v32  ;;  %v2073_v12 = vpack.c.bf16 %v2063_v29, %v2062_v34  ;;  %v2018_v54 = vmul.f32 %v3496_v40, %v1988_v53  ;;  %2583 = vset.pattern.permute.xlu0 %v2692_v0 }
 0x31f   : > { %v1982_v36 = vsub.f32 %v1954_v17, %v3493_v32 }
 0x320   : > { %v2026_v30 = vmul.f32 %v3496_v40, %v1996_v14  ;;  %v2098_v47 = vsel %vm2075_vm2, %v2073_v12, 0  ;;  %v1959_v14 = vmax.f32 %v1927_v20, 0.0 }
 0x321   : > { %v1951_v58 = vpop.f32.mrf.mxu3 }
 0x322   : > { %v1952_v60 = vadd.f32 %v3490_v18, %v1951_v58  ;;  %v2045_v15 = vmul.f32 %v3503_v43, %v2026_v30  ;;  %v2095_v58 = vsel %vm2075_vm2, %v2072_v50, 0  ;;  %v1987_v45 = vsub.f32 %v1959_v14, %v3493_v32 }
 0x323   : > { %v2037_v30 = vmul.f32 %v3503_v43, %v2018_v54 }
 0x324   : > { %v1969_v61 = vmax.f32 %v1952_v60, 0.0  ;;  %v2064_v24 = vadd.f32 %v3510_v46, %v2045_v15  ;;  %v1922_v60 = vadd.f32 %v3490_v18, %v1921_v19  ;;  %v2017_v51 = vmul.f32 %v3496_v40, %v1987_v45 }
 0x325   : > { %v2056_v19 = vadd.f32 %v3510_v46, %v2037_v30  ;;  %v1984_v15 = vsub.f32 %v1956_v7, %v3493_v32 }
 0x326   : > { %v1997_v42 = vsub.f32 %v1969_v61, %v3493_v32  ;;  %v2038_v61 = vmul.f32 %v3503_v43, %v2019_v56  ;;  %v1957_v38 = vmax.f32 %v1922_v60, 0.0  ;;  %v2036_v2 = vmul.f32 %v3503_v43, %v2017_v51 }
 0x327   : > { %v2014_v23 = vmul.f32 %v3496_v40, %v1984_v15 }
 0x328   : > { %v2027_v26 = vmul.f32 %v3496_v40, %v1997_v42  ;;  %v2092_v42 = vsel %vm2075_vm2, %v2071_v49, 0  ;;  %v2057_v62 = vadd.f32 %v3510_v46, %v2038_v61  ;;  %v1985_v48 = vsub.f32 %v1957_v38, %v3493_v32 }
 0x329   : > { %v2035_v49 = vmul.f32 %v3503_v43, %v2016_v3  ;;  %v2033_v52 = vmul.f32 %v3503_v43, %v2014_v23 }
 0x32a   : > { %v2046_v21 = vmul.f32 %v3503_v43, %v2027_v26  ;;  %v1917_v26 = vadd.f32 %v3490_v18, %v3524_v5  ;;  %v2070_v27 = vpack.c.bf16 %v2057_v62, %v2056_v19  ;;  %v2055_v18 = vadd.f32 %v3510_v46, %v2036_v2  ;;  %v2116_v5 = vld [vmem:[#allocation7] sm:$0x1] }
 0x32b   : > { %2119 = vperm.xlu0 %2583, %v2116_v5   ;;  %v2052_v31 = vadd.f32 %v3510_v46, %v2033_v52 }
 0x32c   : > { %v2065_v11 = vadd.f32 %v3510_v46, %v2046_v21  ;;  %v1955_v21 = vmax.f32 %v1917_v26, 0.0  ;;  %v2089_v4 = vsel %vm2075_vm2, %v2070_v27, 0 }
 0x32e   : > { %v2074_v37 = vpack.c.bf16 %v2065_v11, %v2064_v24  ;;  %v2015_v24 = vmul.f32 %v3496_v40, %v1985_v48  ;;  %v2054_v11 = vadd.f32 %v3510_v46, %v2035_v49 }
 0x330   : > { %v2101_v55 = vsel %vm2075_vm2, %v2074_v37, 0  ;;  %v1983_v37 = vsub.f32 %v1955_v21, %v3493_v32  ;;  %v2069_v25 = vpack.c.bf16 %v2055_v18, %v2054_v11  ;;  %v2034_v44 = vmul.f32 %v3503_v43, %v2015_v24 }
 0x331   : > { %2103 = vmatpush.bf16.xpose.msra.mxu1 %v2101_v55  ;;  %v2012_v55 = vmul.f32 %v3496_v40, %v1982_v36 }
 0x332   : > { %v2013_v29 = vmul.f32 %v3496_v40, %v1983_v37  ;;  %v2086_v22 = vsel %vm2075_vm2, %v2069_v25, 0  ;;  %v2053_v34 = vadd.f32 %v3510_v46, %v2034_v44 }
 0x333   : > { %v2031_v32 = vmul.f32 %v3503_v43, %v2012_v55 }
 0x334   : > { %v2068_v59 = vpack.c.bf16 %v2053_v34, %v2052_v31  ;;  %v2032_v9 = vmul.f32 %v3503_v43, %v2013_v29 }
 0x335   : > { %v2050_v8 = vadd.f32 %v3510_v46, %v2031_v32 }
 0x336   : > { %v2083_v12 = vsel %vm2075_vm2, %v2068_v59, 0  ;;  %v2051_v41 = vadd.f32 %v3510_v46, %v2032_v9 }
 0x338   : > { %v2067_v40 = vpack.c.bf16 %v2051_v41, %v2050_v8 }
 0x339   : > { %2104 = vmatpush.bf16.xpose.msra.mxu1 %v2098_v47 }
 0x33a   : > { %v2080_v10 = vsel %vm2075_vm2, %v2067_v40, 0 }
 0x341   : > { %2105 = vmatpush.bf16.xpose.msra.mxu1 %v2095_v58 }
 0x349   : > { %2106 = vmatpush.bf16.xpose.msra.mxu1 %v2092_v42 }
 0x351   : > { %2107 = vmatpush.bf16.xpose.msra.mxu1 %v2089_v4 }
 0x359   : > { %2108 = vmatpush.bf16.xpose.msra.mxu1 %v2086_v22 }
 0x361   : > { %2109 = vmatpush.bf16.xpose.msra.mxu1 %v2083_v12 }
 0x369   : > { %2110 = vmatpush.bf16.xpose.msra.mxu1 %v2080_v10 }
 0x370   : > { %2453 = vmatmul.msk.bf16.vlgmr.msra.gmra.mxu1 %vm2075_vm2, %v2066_v6 }
 0x39d   : > { %v2120_v47 = vpop.permute.xlu0 %2119 }
 0x39e   : > { %v2122_v35 = vperm.slane %v2120_v47, 0 }
 0x3ed   : > { %v2112_v43 = vpop.f32.mrf.mxu1 }
 0x3ee   : > { %v2123_v13 = vadd.f32 %v2122_v35, %v2112_v43 }
 0x3f0   : > { %2124 = vst [vmem:[%s2868_s18] sm:$0x1] %v2123_v13 }
 0x3f5   : > { %v2114_v1 = vpop.f32.mrf.mxu1 }
 0x3f6 PF: > { %p2132_p9 = scmp.eq.s32.totalorder %s2675_s24, 2  ;;  %s2138_s16 = sshll.u32 %s2868_s18, 4  ;;  %s2139_s16 = int_to_ptr.vmem [resolvable:$true] %s2138_s16 }
 0x3f7   : > { %s3708_s27 = sld [smem:[#allocation22_spill]]  ;;  %s3710_s30 = sand.u32 1, %s2663_s21  }
 0x3f8   : > { %s3731_s23 = smov (!%p2132_p9, %s2671_s23), 0  ;;  %s2126_s15 = scalar_lea.sflag [#allocation9], %s3710_s30 }
 0x3fd   : > { %s3709_s29 = smov %s3708_s27  ;;  %s2136_s22 = scalar_lea.hbm %s3708_s27, %s3731_s23 }
 0x3fe   : > { %s2140_s26 = sshll.u32 %s2136_s22, 4  ;;  %s2613_s18 = scalar_lea.hbm %s3709_s29, 3  ;;  %s2141_s26 = int_to_ptr.hbm [resolvable:$true] %s2140_s26 }
 0x3ff   : > { %s2607_s20 = sshra.s32 %s2141_s26, 4  ;;  %s2608_s20 = int_to_ptr.hbm [resolvable:$true] %s2607_s20 }
 0x400   : > { %s2609_s25 = scalar_lea.hbm %s2608_s20, 1  ;;  %p2614_p13 = scmp.lt.s32.totalorder %s2608_s20, %s3709_s29 }
 0x401   : > { %p2610_p10 = scmp.ne.s32.totalorder %s2608_s20, %s2609_s25  ;;  %p2615_p0 = scmp.lt.s32.totalorder %s2613_s18, %s2609_s25 }
 0x403   : > { %p2611_p11 = pnand %p2610_p10, %p2831_p7  ;;  %p2616_p1 = por %p2615_p0, %p2614_p13 }
 0x405   : > { %p2612_p12 = pneg %p2611_p11 }
 0x407   : > { %p2617_p2 = pnand %p2616_p1, %p2612_p12 }
 0x409   : > { %2620 = shalt.err (!%p2617_p2)
}
 0x40a   : > { %2502 = dma.vmem_to_hbm [thread:$0]  (%p2831_p7), %s2139_s16, 16, %s2141_s26, %s2126_s15  }
 0x40b PF: > { %s3711_s23 = sld [smem:[#allocation15_spill]] }
 0x40c   : > { %s3712_s19 = sld [smem:[#allocation11_spill]] }
 0x411   : > { %p2508_p3 = scmp.ge.s32.totalorder %s3711_s23, 2 }
 0x412   : > { %s2152_s27 = sand.u32 1, %s3712_s19  }
 0x413   : > { %p2505_p4 = pnand %p2508_p3, %p2835_p8  ;;  %s2153_s22 = scalar_lea.sflag [#allocation9], %s2152_s27 }
 0x415   : > { %p2506_p5 = pneg %p2505_p4 }
 0x417   : > { %2654 = dma.done.wait (%p2506_p5), %s2153_s22, 16  }
 0x418   : > { %2656 = vsyncadd (%p2506_p5), %s2153_s22, 4294967280  ;;  %s30_s27 = sadd.s32 1, %s3711_s23   ;;  %s3714_s0 = sld [smem:[#allocation12_spill]] }
 0x419   : > { %p27_p6 = scmp.ge.s32.totalorder %s30_s27, 11   ;;  %s3715_s22 = sld [smem:[#allocation19_spill]] }
 0x41a   : > { %s3716_s23 = sld [smem:[#allocation13_spill]]  ;;  %s3720_s20 = smov %s2663_s21 }
 0x41b   : > { %s3717_s24 = sld [smem:[#allocation14_spill]]  ;;  %29 = sbr.rel (!%p27_p6) target bundleno = 9 (0x9), region = 140 }
 0x41c   : > { %s3718_s25 = sld [smem:[#allocation16_spill]] }
 0x41d   : > { %s3719_s26 = sld [smem:[#allocation17_spill]] }
 0x41e   : > { %s3721_s21 = smov %s3714_s0 }
 0x420   :  { %2158 = vsyncpa [#allocation9], 1 }
 0x421   :  { %2160 = vsyncpa [#allocation9 + $0x1], 1 }

</bundles_post_ra>
